<compile_context>
chip_gen: v5e
topology: v5e:2x2
jax: 0.10.0
libtpu: 0.0.40
codegen_flags: <defaults>
</compile_context>

<pallas_src>
import jax
import jax.numpy as jnp
import numpy as np
from jax import lax
from jax.experimental import pallas as pl
from jax.experimental.pallas import tpu as pltpu


# ----------------------------- Pallas kernel -------------------------------
def dcn_kernel(idx_ref, embt_ref, linc_ref, wct_ref, bct_ref,
               w1t_ref, b1t_ref, w2t_ref, b2t_ref, wlc_ref, blast_ref,
               out_ref):
    """Gather + cross network + MLP tower + final FC, batch-on-lanes layout.

    idx_ref   : (F, TB) int32   offset field indices, batch on lanes (streamed)
    embt_ref  : (K, NI) bf16    embedding table, transposed (VMEM resident)
    linc_ref  : (NI, 1) f32     EmbeddingBag('sum') table as a column
    wct_ref   : (L, D0, D0) bf16  cross weights (already W_l^T)
    bct_ref   : (L, D0, 1)  f32   cross biases (columns)
    w1t/b1t   : (H1, D0) bf16 / (H1, 1) f32   MLP layer 1 (BN folded in)
    w2t/b2t   : (H2, H1) bf16 / (H2, 1) f32   MLP layer 2 (BN folded in)
    wlc_ref   : (H2, 1) f32     final FC weight column
    blast_ref : (1, 1)  f32     final FC bias
    out_ref   : (1, TB) f32     logits (pre-sigmoid), lane-dense store
    """
    F, TB = idx_ref.shape
    K, NI = embt_ref.shape

    idx = idx_ref[...]                                     # (F, TB) int32
    embt = embt_ref[...]                                   # (K, NI) bf16

    # ---- in-kernel embedding "gather" via one-hot MXU matmul ----------------
    # TODO(synk): swap for a DMA gather when the table no longer fits VMEM.
    iota = lax.broadcasted_iota(jnp.int32, (NI, TB), 0)    # hoisted, reused
    parts = []
    multihot = jnp.zeros((NI, TB), jnp.float32)
    for f in range(F):                                     # static unroll
        eq = iota == idx[f:f + 1, :]                       # (NI, TB) bool
        oh = jnp.where(eq, 1.0, 0.0)                       # f32 one-hot
        parts.append(jnp.dot(embt, oh.astype(jnp.bfloat16),
                             preferred_element_type=jnp.float32))   # (K, TB)
        multihot = multihot + oh
    x0 = jnp.concatenate(parts, axis=0)                    # (D0, TB) f32

    # linear_model (EmbeddingBag 'sum'): VPU multiply + sublane reduce.
    lin = jnp.sum(linc_ref[...] * multihot, axis=0, keepdims=True)   # (1, TB)

    # ---- DCN-V2 cross network: x_{l+1} = x0 * (W_l^T x_l + b_l) + x_l -------
    x = x0                                                 # carried in f32
    for l in range(wct_ref.shape[0]):                      # static unroll
        xw = jnp.dot(wct_ref[l], x.astype(jnp.bfloat16),   # bf16 MXU, f32 acc
                     preferred_element_type=jnp.float32) + bct_ref[l]
        x = x0 * xw + x                                    # lane-dense VPU

    # ---- MLP tower (BatchNorm folded in, Dropout = identity) ----------------
    h = jnp.dot(w1t_ref[...], x.astype(jnp.bfloat16),
                preferred_element_type=jnp.float32) + b1t_ref[...]
    h = jnp.maximum(h, 0.0)
    h = jnp.dot(w2t_ref[...], h.astype(jnp.bfloat16),
                preferred_element_type=jnp.float32) + b2t_ref[...]
    h = jnp.maximum(h, 0.0)

    # ---- final FC: M=1 matmul replaced by VPU multiply + sublane reduce -----
    logit = jnp.sum(wlc_ref[...] * h, axis=0, keepdims=True)         # (1, TB)

    out_ref[...] = logit + lin + blast_ref[...]            # lane-dense store


# ------------------------------- Wrapper ------------------------------------
def _pick_tile_b(B, tile_b):
    """Prefer large lane-dense tiles (512-2048) and an EVEN number of tiles
    (balanced across v7x's two TensorCores); fall back to >=2 tiles, then to a
    single full-batch tile for small/ragged batches."""
    if tile_b is not None:
        assert B % tile_b == 0, "tile_b must divide the batch size"
        return tile_b
    candidates = (2048, 1024, 512, 256, 128)
    for tb in candidates:
        if B % tb == 0 and (B // tb) >= 2 and (B // tb) % 2 == 0:
            return tb
    for tb in candidates:
        if B % tb == 0 and (B // tb) >= 2:
            return tb
    return B


def dcnv2_forward(x_idx, params, *, tile_b=None):
    """x_idx: int32 (B, F) raw field indices (before offsets)."""
    B, F = x_idx.shape
    # Only the tiny int32 indices are prepared wrapper-side (no (B, D0)
    # activation materialization / HBM transpose any more).
    idx_t = (x_idx + params["offsets"]).astype(jnp.int32).T           # (F, B)

    # Tiny constant views (constant-folded under jit).
    emb_t = params["emb_table"].T                          # (K, NI)  bf16
    lin_c = params["lin_table"].astype(jnp.float32)        # (NI, 1)  f32
    wc_t = jnp.transpose(params["wc"], (0, 2, 1))          # (L, D0, D0) bf16
    bc_t = jnp.transpose(params["bc"], (0, 2, 1))          # (L, D0, 1)  f32
    w1_t, b1_t = params["w1"].T, params["b1"].T            # (H1, D0), (H1, 1)
    w2_t, b2_t = params["w2"].T, params["b2"].T            # (H2, H1), (H2, 1)
    wl_c = params["wlast"].astype(jnp.float32)             # (H2, 1)  f32
    blast = params["blast"]                                # (1, 1)   f32

    K, NI = emb_t.shape
    L, D0, _ = wc_t.shape
    H1, H2 = w1_t.shape[0], w2_t.shape[0]

    TB = _pick_tile_b(B, tile_b)
    NB = B // TB

    # Constant-index blocks: fetched once, single-buffered (saves VMEM).
    def const_spec(shape):
        nd = len(shape)
        return pl.BlockSpec(shape, lambda i: (0,) * nd,
                            pipeline_mode=pl.Buffered(1))

    # TODO(synk): at production D0 / table sizes, re-derive TB against the
    # per-generation VMEM budget (v7x: 64 MiB physical) and the weight stack.
    out = pl.pallas_call(
        dcn_kernel,
        out_shape=jax.ShapeDtypeStruct((1, B), jnp.float32),
        grid=(NB,),
        in_specs=[
            pl.BlockSpec((F, TB), lambda i: (0, i)),       # indices (streamed)
            const_spec((K, NI)),                            # embedding table^T
            const_spec((NI, 1)),                            # linear table col
            const_spec((L, D0, D0)),                        # cross weights^T
            const_spec((L, D0, 1)),                         # cross biases
            const_spec((H1, D0)),                           # MLP layer 1 W^T
            const_spec((H1, 1)),                            # MLP layer 1 b
            const_spec((H2, H1)),                           # MLP layer 2 W^T
            const_spec((H2, 1)),                            # MLP layer 2 b
            const_spec((H2, 1)),                            # final FC weight
            const_spec((1, 1)),                             # final FC bias
        ],
        out_specs=pl.BlockSpec((1, TB), lambda i: (0, i)),  # lane-dense output
        compiler_params=pltpu.CompilerParams(
            dimension_semantics=("parallel",),
            vmem_limit_bytes=48 * 1024 * 1024),
    )(idx_t, emb_t, lin_c, wc_t, bc_t, w1_t, b1_t, w2_t, b2_t, wl_c, blast)

    return out[0]                                           # (B,)


# ------------------------- Parameter construction ---------------------------
def make_params(field_dims, num_factor, hidden_sizes, num_layers, key):
    num_inputs = sum(field_dims)
    F = len(field_dims)
    D0 = num_factor * F
    keys = jax.random.split(key, 16)
    k = iter(keys)

    def xavier(kk, shape):
        fan_in, fan_out = shape
        bound = float(np.sqrt(6.0 / (fan_in + fan_out)))
        return jax.random.uniform(kk, shape, jnp.float32, -bound, bound)

    # Embedding (xavier_uniform) and EmbeddingBag (normal init); bf16 storage.
    emb_table = xavier(next(k), (num_inputs, num_factor)).astype(jnp.bfloat16)
    lin_table = jax.random.normal(next(k), (num_inputs, 1),
                                  jnp.float32).astype(jnp.bfloat16)

    # Cross head: num_layers of (D0, D0) weights + biases.
    wc = jnp.stack([xavier(next(k), (D0, D0))
                    for _ in range(num_layers)]).astype(jnp.bfloat16)
    bc = jax.random.uniform(next(k), (num_layers, 1, D0), jnp.float32, -0.1, 0.1)

    # MLP tower with BatchNorm1d (eval, fresh stats) folded in.
    bn_scale = 1.0 / np.sqrt(1.0 + 1e-5)
    H1, H2 = hidden_sizes
    w1 = (xavier(next(k), (D0, H1)) * bn_scale).astype(jnp.bfloat16)
    b1 = jax.random.uniform(next(k), (1, H1), jnp.float32, -0.1, 0.1) * bn_scale
    w2 = (xavier(next(k), (H1, H2)) * bn_scale).astype(jnp.bfloat16)
    b2 = jax.random.uniform(next(k), (1, H2), jnp.float32, -0.1, 0.1) * bn_scale

    wlast = xavier(next(k), (H2, 1)).astype(jnp.bfloat16)
    blast = jax.random.uniform(next(k), (1, 1), jnp.float32, -0.1, 0.1)

    offsets = jnp.asarray(
        np.concatenate([[0], np.cumsum(field_dims)[:-1]])[None, :], jnp.int32)

    return dict(emb_table=emb_table, lin_table=lin_table, wc=wc, bc=bc,
                w1=w1, b1=b1, w2=w2, b2=b2, wlast=wlast, blast=blast,
                offsets=offsets)


# ----------------------------- Pure-JAX reference ---------------------------
def dcnv2_reference(x_idx, params):
    idx = x_idx + params["offsets"]
    B = x_idx.shape[0]

    def mm(a_f32, w_bf16):
        # Mimic the kernel's bf16 MXU matmuls with f32 accumulation.
        return jnp.dot(a_f32.astype(jnp.bfloat16).astype(jnp.float32),
                       w_bf16.astype(jnp.float32))

    x0 = params["emb_table"][idx].reshape(B, -1).astype(jnp.float32)
    x = x0
    for l in range(params["wc"].shape[0]):
        x = x0 * (mm(x, params["wc"][l]) + params["bc"][l]) + x
    h = jnp.maximum(mm(x, params["w1"]) + params["b1"], 0.0)
    h = jnp.maximum(mm(h, params["w2"]) + params["b2"], 0.0)
    # Final FC is done on the VPU in f32 inside the kernel; mirror that here.
    logit = jnp.dot(h, params["wlast"].astype(jnp.float32)) + params["blast"]
    lin = jnp.sum(params["lin_table"][idx][..., 0].astype(jnp.float32),
                  axis=1, keepdims=True)
    return (logit + lin)[:, 0]


# --------------------------------- Main --------------------------------------
if __name__ == "__main__":
    field_dims = [4, 6, 8, 6]       # F = 4 fields, 24 total categories
    num_factor = 8                  # D0 = 32
    hidden_sizes = [32, 16]
    num_layers = 3
    B = 1024                        # -> TB = 512, grid = (2,) (even, balanced)

    key = jax.random.PRNGKey(0)
    kp, kx = jax.random.split(key)
    params = make_params(field_dims, num_factor, hidden_sizes, num_layers, kp)

    # x: (B, F) int32, each column in [0, field_dims[f]).
    cols = []
    kxs = jax.random.split(kx, len(field_dims))
    for f, fd in enumerate(field_dims):
        cols.append(jax.random.randint(kxs[f], (B,), 0, fd, jnp.int32))
    x = jnp.stack(cols, axis=1)

    fwd = jax.jit(dcnv2_forward)                 # let _pick_tile_b choose TB
    scores = jax.block_until_ready(fwd(x, params))

    ref = dcnv2_reference(x, params)
    # bf16 storage + bf16 MXU matmuls -> compare at bf16-level tolerance.
    np.testing.assert_allclose(np.asarray(scores), np.asarray(ref),
                               rtol=1e-2, atol=1e-2)
    print("KERNEL_OK")
</pallas_src>

<mosaic_0001>
module attributes {stable_mosaic.version = 11 : i64} {
  func.func @dcn_kernel(%arg0: i32, %arg1: memref<4x512xi32, #tpu.memory_space<vmem>>, %arg2: memref<8x24xbf16, #tpu.memory_space<vmem>>, %arg3: memref<24x1xf32, #tpu.memory_space<vmem>>, %arg4: memref<3x32x32xbf16, #tpu.memory_space<vmem>>, %arg5: memref<3x32x1xf32, #tpu.memory_space<vmem>>, %arg6: memref<32x32xbf16, #tpu.memory_space<vmem>>, %arg7: memref<32x1xf32, #tpu.memory_space<vmem>>, %arg8: memref<16x32xbf16, #tpu.memory_space<vmem>>, %arg9: memref<16x1xf32, #tpu.memory_space<vmem>>, %arg10: memref<16x1xf32, #tpu.memory_space<vmem>>, %arg11: memref<1x1xf32, #tpu.memory_space<vmem>>, %arg12: memref<1x512xf32, #tpu.memory_space<vmem>>) attributes {dimension_semantics = [#tpu.dimension_semantics<parallel>], iteration_bounds = array<i64: 2>, scalar_prefetch = 0 : i64, scratch_operands = 0 : i64, tpu.core_type = #tpu.core_type<tc>, window_params = [{transform_indices = @transform_0, window_bounds = array<i64: 4, 512>}, {pipeline_mode = #tpu.pipeline_mode<synchronous>, transform_indices = @transform_1, window_bounds = array<i64: 8, 24>}, {pipeline_mode = #tpu.pipeline_mode<synchronous>, transform_indices = @transform_2, window_bounds = array<i64: 24, 1>}, {pipeline_mode = #tpu.pipeline_mode<synchronous>, transform_indices = @transform_3, window_bounds = array<i64: 3, 32, 32>}, {pipeline_mode = #tpu.pipeline_mode<synchronous>, transform_indices = @transform_4, window_bounds = array<i64: 3, 32, 1>}, {pipeline_mode = #tpu.pipeline_mode<synchronous>, transform_indices = @transform_5, window_bounds = array<i64: 32, 32>}, {pipeline_mode = #tpu.pipeline_mode<synchronous>, transform_indices = @transform_6, window_bounds = array<i64: 32, 1>}, {pipeline_mode = #tpu.pipeline_mode<synchronous>, transform_indices = @transform_7, window_bounds = array<i64: 16, 32>}, {pipeline_mode = #tpu.pipeline_mode<synchronous>, transform_indices = @transform_8, window_bounds = array<i64: 16, 1>}, {pipeline_mode = #tpu.pipeline_mode<synchronous>, transform_indices = @transform_9, window_bounds = array<i64: 16, 1>}, {pipeline_mode = #tpu.pipeline_mode<synchronous>, transform_indices = @transform_10, window_bounds = array<i64: 1, 1>}, {transform_indices = @transform_11, window_bounds = array<i64: 1, 512>}]} {
    %c0 = arith.constant 0 : index
    %c0_0 = arith.constant 0 : index
    %0 = vector.load %arg1[%c0, %c0_0] : memref<4x512xi32, #tpu.memory_space<vmem>>, vector<4x512xi32>
    %c0_1 = arith.constant 0 : index
    %c0_2 = arith.constant 0 : index
    %1 = vector.load %arg2[%c0_1, %c0_2] : memref<8x24xbf16, #tpu.memory_space<vmem>>, vector<8x24xbf16>
    %2 = tpu.iota {dimensions = array<i32: 0>} : vector<24x512xi32>
    %cst = arith.constant 0.000000e+00 : f32
    %3 = vector.broadcast %cst : f32 to vector<24x512xf32>
    %4 = vector.extract_strided_slice %0 {offsets = [0, 0], sizes = [1, 512], strides = [1, 1]} : vector<4x512xi32> to vector<1x512xi32>
    %5 = vector.broadcast %4 : vector<1x512xi32> to vector<24x512xi32>
    %6 = arith.cmpi eq, %2, %5 : vector<24x512xi32>
    %cst_3 = arith.constant 1.000000e+00 : f32
    %cst_4 = arith.constant 0.000000e+00 : f32
    %7 = vector.broadcast %cst_3 : f32 to vector<24x512xf32>
    %8 = vector.broadcast %cst_4 : f32 to vector<24x512xf32>
    %9 = arith.select %6, %7, %8 : vector<24x512xi1>, vector<24x512xf32>
    %10 = arith.truncf %9 : vector<24x512xf32> to vector<24x512xbf16>
    %cst_5 = arith.constant dense<0.000000e+00> : vector<8x512xf32>
    %11 = tpu.matmul %1, %10, %cst_5 {dimension_numbers = #tpu.dot_dimension_numbers<[1], [0], [0], [1], [0, 0, 1, 1], [], []>} : vector<8x24xbf16>, vector<24x512xbf16>, vector<8x512xf32> -> vector<8x512xf32>
    %12 = arith.addf %3, %9 : vector<24x512xf32>
    %13 = vector.extract_strided_slice %0 {offsets = [1, 0], sizes = [1, 512], strides = [1, 1]} : vector<4x512xi32> to vector<1x512xi32>
    %14 = vector.broadcast %13 : vector<1x512xi32> to vector<24x512xi32>
    %15 = arith.cmpi eq, %2, %14 : vector<24x512xi32>
    %cst_6 = arith.constant 1.000000e+00 : f32
    %cst_7 = arith.constant 0.000000e+00 : f32
    %16 = vector.broadcast %cst_6 : f32 to vector<24x512xf32>
    %17 = vector.broadcast %cst_7 : f32 to vector<24x512xf32>
    %18 = arith.select %15, %16, %17 : vector<24x512xi1>, vector<24x512xf32>
    %19 = arith.truncf %18 : vector<24x512xf32> to vector<24x512xbf16>
    %cst_8 = arith.constant dense<0.000000e+00> : vector<8x512xf32>
    %20 = tpu.matmul %1, %19, %cst_8 {dimension_numbers = #tpu.dot_dimension_numbers<[1], [0], [0], [1], [0, 0, 1, 1], [], []>} : vector<8x24xbf16>, vector<24x512xbf16>, vector<8x512xf32> -> vector<8x512xf32>
    %21 = arith.addf %12, %18 : vector<24x512xf32>
    %22 = vector.extract_strided_slice %0 {offsets = [2, 0], sizes = [1, 512], strides = [1, 1]} : vector<4x512xi32> to vector<1x512xi32>
    %23 = vector.broadcast %22 : vector<1x512xi32> to vector<24x512xi32>
    %24 = arith.cmpi eq, %2, %23 : vector<24x512xi32>
    %cst_9 = arith.constant 1.000000e+00 : f32
    %cst_10 = arith.constant 0.000000e+00 : f32
    %25 = vector.broadcast %cst_9 : f32 to vector<24x512xf32>
    %26 = vector.broadcast %cst_10 : f32 to vector<24x512xf32>
    %27 = arith.select %24, %25, %26 : vector<24x512xi1>, vector<24x512xf32>
    %28 = arith.truncf %27 : vector<24x512xf32> to vector<24x512xbf16>
    %cst_11 = arith.constant dense<0.000000e+00> : vector<8x512xf32>
    %29 = tpu.matmul %1, %28, %cst_11 {dimension_numbers = #tpu.dot_dimension_numbers<[1], [0], [0], [1], [0, 0, 1, 1], [], []>} : vector<8x24xbf16>, vector<24x512xbf16>, vector<8x512xf32> -> vector<8x512xf32>
    %30 = arith.addf %21, %27 : vector<24x512xf32>
    %31 = vector.extract_strided_slice %0 {offsets = [3, 0], sizes = [1, 512], strides = [1, 1]} : vector<4x512xi32> to vector<1x512xi32>
    %32 = vector.broadcast %31 : vector<1x512xi32> to vector<24x512xi32>
    %33 = arith.cmpi eq, %2, %32 : vector<24x512xi32>
    %cst_12 = arith.constant 1.000000e+00 : f32
    %cst_13 = arith.constant 0.000000e+00 : f32
    %34 = vector.broadcast %cst_12 : f32 to vector<24x512xf32>
    %35 = vector.broadcast %cst_13 : f32 to vector<24x512xf32>
    %36 = arith.select %33, %34, %35 : vector<24x512xi1>, vector<24x512xf32>
    %37 = arith.truncf %36 : vector<24x512xf32> to vector<24x512xbf16>
    %cst_14 = arith.constant dense<0.000000e+00> : vector<8x512xf32>
    %38 = tpu.matmul %1, %37, %cst_14 {dimension_numbers = #tpu.dot_dimension_numbers<[1], [0], [0], [1], [0, 0, 1, 1], [], []>} : vector<8x24xbf16>, vector<24x512xbf16>, vector<8x512xf32> -> vector<8x512xf32>
    %39 = arith.addf %30, %36 : vector<24x512xf32>
    %40 = tpu.concatenate %11, %20, %29, %38 in 0 : vector<8x512xf32>, vector<8x512xf32>, vector<8x512xf32>, vector<8x512xf32> -> vector<32x512xf32>
    %c0_15 = arith.constant 0 : index
    %c0_16 = arith.constant 0 : index
    %41 = vector.load %arg3[%c0_15, %c0_16] : memref<24x1xf32, #tpu.memory_space<vmem>>, vector<24x1xf32>
    %42 = vector.broadcast %41 : vector<24x1xf32> to vector<24x512xf32>
    %43 = arith.mulf %42, %39 : vector<24x512xf32>
    %cst_17 = arith.constant dense<0.000000e+00> : vector<512xf32>
    %44 = vector.multi_reduction <add>, %43, %cst_17 [0] : vector<24x512xf32> to vector<512xf32>
    %45 = vector.shape_cast %44 : vector<512xf32> to vector<1x512xf32>
    %c0_18 = arith.constant 0 : index
    %c0_19 = arith.constant 0 : index
    %c0_20 = arith.constant 0 : index
    %46 = vector.load %arg4[%c0_18, %c0_19, %c0_20] : memref<3x32x32xbf16, #tpu.memory_space<vmem>>, vector<1x32x32xbf16>
    %47 = vector.shape_cast %46 : vector<1x32x32xbf16> to vector<32x32xbf16>
    %48 = arith.truncf %40 : vector<32x512xf32> to vector<32x512xbf16>
    %cst_21 = arith.constant dense<0.000000e+00> : vector<32x512xf32>
    %49 = tpu.matmul %47, %48, %cst_21 {dimension_numbers = #tpu.dot_dimension_numbers<[1], [0], [0], [1], [0, 0, 1, 1], [], []>} : vector<32x32xbf16>, vector<32x512xbf16>, vector<32x512xf32> -> vector<32x512xf32>
    %c0_22 = arith.constant 0 : index
    %c0_23 = arith.constant 0 : index
    %c0_24 = arith.constant 0 : index
    %50 = vector.load %arg5[%c0_22, %c0_23, %c0_24] : memref<3x32x1xf32, #tpu.memory_space<vmem>>, vector<1x32x1xf32>
    %51 = vector.shape_cast %50 : vector<1x32x1xf32> to vector<32x1xf32>
    %52 = vector.broadcast %51 : vector<32x1xf32> to vector<32x512xf32>
    %53 = arith.addf %49, %52 : vector<32x512xf32>
    %54 = arith.mulf %40, %53 : vector<32x512xf32>
    %55 = arith.addf %54, %40 : vector<32x512xf32>
    %c1 = arith.constant 1 : index
    %c0_25 = arith.constant 0 : index
    %c0_26 = arith.constant 0 : index
    %56 = vector.load %arg4[%c1, %c0_25, %c0_26] : memref<3x32x32xbf16, #tpu.memory_space<vmem>>, vector<1x32x32xbf16>
    %57 = vector.shape_cast %56 : vector<1x32x32xbf16> to vector<32x32xbf16>
    %58 = arith.truncf %55 : vector<32x512xf32> to vector<32x512xbf16>
    %cst_27 = arith.constant dense<0.000000e+00> : vector<32x512xf32>
    %59 = tpu.matmul %57, %58, %cst_27 {dimension_numbers = #tpu.dot_dimension_numbers<[1], [0], [0], [1], [0, 0, 1, 1], [], []>} : vector<32x32xbf16>, vector<32x512xbf16>, vector<32x512xf32> -> vector<32x512xf32>
    %c1_28 = arith.constant 1 : index
    %c0_29 = arith.constant 0 : index
    %c0_30 = arith.constant 0 : index
    %60 = vector.load %arg5[%c1_28, %c0_29, %c0_30] : memref<3x32x1xf32, #tpu.memory_space<vmem>>, vector<1x32x1xf32>
    %61 = vector.shape_cast %60 : vector<1x32x1xf32> to vector<32x1xf32>
    %62 = vector.broadcast %61 : vector<32x1xf32> to vector<32x512xf32>
    %63 = arith.addf %59, %62 : vector<32x512xf32>
    %64 = arith.mulf %40, %63 : vector<32x512xf32>
    %65 = arith.addf %64, %55 : vector<32x512xf32>
    %c2 = arith.constant 2 : index
    %c0_31 = arith.constant 0 : index
    %c0_32 = arith.constant 0 : index
    %66 = vector.load %arg4[%c2, %c0_31, %c0_32] : memref<3x32x32xbf16, #tpu.memory_space<vmem>>, vector<1x32x32xbf16>
    %67 = vector.shape_cast %66 : vector<1x32x32xbf16> to vector<32x32xbf16>
    %68 = arith.truncf %65 : vector<32x512xf32> to vector<32x512xbf16>
    %cst_33 = arith.constant dense<0.000000e+00> : vector<32x512xf32>
    %69 = tpu.matmul %67, %68, %cst_33 {dimension_numbers = #tpu.dot_dimension_numbers<[1], [0], [0], [1], [0, 0, 1, 1], [], []>} : vector<32x32xbf16>, vector<32x512xbf16>, vector<32x512xf32> -> vector<32x512xf32>
    %c2_34 = arith.constant 2 : index
    %c0_35 = arith.constant 0 : index
    %c0_36 = arith.constant 0 : index
    %70 = vector.load %arg5[%c2_34, %c0_35, %c0_36] : memref<3x32x1xf32, #tpu.memory_space<vmem>>, vector<1x32x1xf32>
    %71 = vector.shape_cast %70 : vector<1x32x1xf32> to vector<32x1xf32>
    %72 = vector.broadcast %71 : vector<32x1xf32> to vector<32x512xf32>
    %73 = arith.addf %69, %72 : vector<32x512xf32>
    %74 = arith.mulf %40, %73 : vector<32x512xf32>
    %75 = arith.addf %74, %65 : vector<32x512xf32>
    %c0_37 = arith.constant 0 : index
    %c0_38 = arith.constant 0 : index
    %76 = vector.load %arg6[%c0_37, %c0_38] : memref<32x32xbf16, #tpu.memory_space<vmem>>, vector<32x32xbf16>
    %77 = arith.truncf %75 : vector<32x512xf32> to vector<32x512xbf16>
    %cst_39 = arith.constant dense<0.000000e+00> : vector<32x512xf32>
    %78 = tpu.matmul %76, %77, %cst_39 {dimension_numbers = #tpu.dot_dimension_numbers<[1], [0], [0], [1], [0, 0, 1, 1], [], []>} : vector<32x32xbf16>, vector<32x512xbf16>, vector<32x512xf32> -> vector<32x512xf32>
    %c0_40 = arith.constant 0 : index
    %c0_41 = arith.constant 0 : index
    %79 = vector.load %arg7[%c0_40, %c0_41] : memref<32x1xf32, #tpu.memory_space<vmem>>, vector<32x1xf32>
    %80 = vector.broadcast %79 : vector<32x1xf32> to vector<32x512xf32>
    %81 = arith.addf %78, %80 : vector<32x512xf32>
    %cst_42 = arith.constant 0.000000e+00 : f32
    %82 = vector.broadcast %cst_42 : f32 to vector<32x512xf32>
    %83 = arith.maximumf %81, %82 : vector<32x512xf32>
    %c0_43 = arith.constant 0 : index
    %c0_44 = arith.constant 0 : index
    %84 = vector.load %arg8[%c0_43, %c0_44] : memref<16x32xbf16, #tpu.memory_space<vmem>>, vector<16x32xbf16>
    %85 = arith.truncf %83 : vector<32x512xf32> to vector<32x512xbf16>
    %cst_45 = arith.constant dense<0.000000e+00> : vector<16x512xf32>
    %86 = tpu.matmul %84, %85, %cst_45 {dimension_numbers = #tpu.dot_dimension_numbers<[1], [0], [0], [1], [0, 0, 1, 1], [], []>} : vector<16x32xbf16>, vector<32x512xbf16>, vector<16x512xf32> -> vector<16x512xf32>
    %c0_46 = arith.constant 0 : index
    %c0_47 = arith.constant 0 : index
    %87 = vector.load %arg9[%c0_46, %c0_47] : memref<16x1xf32, #tpu.memory_space<vmem>>, vector<16x1xf32>
    %88 = vector.broadcast %87 : vector<16x1xf32> to vector<16x512xf32>
    %89 = arith.addf %86, %88 : vector<16x512xf32>
    %cst_48 = arith.constant 0.000000e+00 : f32
    %90 = vector.broadcast %cst_48 : f32 to vector<16x512xf32>
    %91 = arith.maximumf %89, %90 : vector<16x512xf32>
    %c0_49 = arith.constant 0 : index
    %c0_50 = arith.constant 0 : index
    %92 = vector.load %arg10[%c0_49, %c0_50] : memref<16x1xf32, #tpu.memory_space<vmem>>, vector<16x1xf32>
    %93 = vector.broadcast %92 : vector<16x1xf32> to vector<16x512xf32>
    %94 = arith.mulf %93, %91 : vector<16x512xf32>
    %cst_51 = arith.constant dense<0.000000e+00> : vector<512xf32>
    %95 = vector.multi_reduction <add>, %94, %cst_51 [0] : vector<16x512xf32> to vector<512xf32>
    %96 = vector.shape_cast %95 : vector<512xf32> to vector<1x512xf32>
    %97 = arith.addf %96, %45 : vector<1x512xf32>
    %c0_52 = arith.constant 0 : index
    %c0_53 = arith.constant 0 : index
    %98 = vector.load %arg11[%c0_52, %c0_53] : memref<1x1xf32, #tpu.memory_space<vmem>>, vector<1x1xf32>
    %99 = vector.broadcast %98 : vector<1x1xf32> to vector<1x512xf32>
    %100 = arith.addf %97, %99 : vector<1x512xf32>
    %c0_54 = arith.constant 0 : index
    %c0_55 = arith.constant 0 : index
    %101 = vector.load %arg12[%c0_54, %c0_55] : memref<1x512xf32, #tpu.memory_space<vmem>>, vector<1x512xf32>
    tpu.vector_store %arg12[%c0_54, %c0_55], %100 {strides = array<i32>} : memref<1x512xf32, #tpu.memory_space<vmem>>, vector<1x512xf32>,
    return
  }
  func.func @transform_0(%arg0: i32) -> (i32, i32) {
    %c0_i32 = arith.constant 0 : i32
    %c0_i32_0 = arith.constant 0 : i32
    return %c0_i32, %arg0 : i32, i32
  }
  func.func @transform_1(%arg0: i32) -> (i32, i32) {
    %c0_i32 = arith.constant 0 : i32
    %c0_i32_0 = arith.constant 0 : i32
    %c0_i32_1 = arith.constant 0 : i32
    return %c0_i32, %c0_i32_0 : i32, i32
  }
  func.func @transform_2(%arg0: i32) -> (i32, i32) {
    %c0_i32 = arith.constant 0 : i32
    %c0_i32_0 = arith.constant 0 : i32
    %c0_i32_1 = arith.constant 0 : i32
    return %c0_i32, %c0_i32_0 : i32, i32
  }
  func.func @transform_3(%arg0: i32) -> (i32, i32, i32) {
    %c0_i32 = arith.constant 0 : i32
    %c0_i32_0 = arith.constant 0 : i32
    %c0_i32_1 = arith.constant 0 : i32
    %c0_i32_2 = arith.constant 0 : i32
    return %c0_i32, %c0_i32_0, %c0_i32_1 : i32, i32, i32
  }
  func.func @transform_4(%arg0: i32) -> (i32, i32, i32) {
    %c0_i32 = arith.constant 0 : i32
    %c0_i32_0 = arith.constant 0 : i32
    %c0_i32_1 = arith.constant 0 : i32
    %c0_i32_2 = arith.constant 0 : i32
    return %c0_i32, %c0_i32_0, %c0_i32_1 : i32, i32, i32
  }
  func.func @transform_5(%arg0: i32) -> (i32, i32) {
    %c0_i32 = arith.constant 0 : i32
    %c0_i32_0 = arith.constant 0 : i32
    %c0_i32_1 = arith.constant 0 : i32
    return %c0_i32, %c0_i32_0 : i32, i32
  }
  func.func @transform_6(%arg0: i32) -> (i32, i32) {
    %c0_i32 = arith.constant 0 : i32
    %c0_i32_0 = arith.constant 0 : i32
    %c0_i32_1 = arith.constant 0 : i32
    return %c0_i32, %c0_i32_0 : i32, i32
  }
  func.func @transform_7(%arg0: i32) -> (i32, i32) {
    %c0_i32 = arith.constant 0 : i32
    %c0_i32_0 = arith.constant 0 : i32
    %c0_i32_1 = arith.constant 0 : i32
    return %c0_i32, %c0_i32_0 : i32, i32
  }
  func.func @transform_8(%arg0: i32) -> (i32, i32) {
    %c0_i32 = arith.constant 0 : i32
    %c0_i32_0 = arith.constant 0 : i32
    %c0_i32_1 = arith.constant 0 : i32
    return %c0_i32, %c0_i32_0 : i32, i32
  }
  func.func @transform_9(%arg0: i32) -> (i32, i32) {
    %c0_i32 = arith.constant 0 : i32
    %c0_i32_0 = arith.constant 0 : i32
    %c0_i32_1 = arith.constant 0 : i32
    return %c0_i32, %c0_i32_0 : i32, i32
  }
  func.func @transform_10(%arg0: i32) -> (i32, i32) {
    %c0_i32 = arith.constant 0 : i32
    %c0_i32_0 = arith.constant 0 : i32
    %c0_i32_1 = arith.constant 0 : i32
    return %c0_i32, %c0_i32_0 : i32, i32
  }
  func.func @transform_11(%arg0: i32) -> (i32, i32) {
    %c0_i32 = arith.constant 0 : i32
    %c0_i32_0 = arith.constant 0 : i32
    return %c0_i32, %arg0 : i32, i32
  }
}

</mosaic_0001>

<bundles_post_ra>
// kernel: dcnv2_forward.1
= control target key start
LH: loop header
LB: loop body
LE: loop exit
PB: predicated region body
PF: predicated region fallthrough
CT: control target
= control target key end

     0   :  { %s3098_s0 = inlined_call_operand.vmem [shape: s32[4,1024], index: 0, kind: input, shape index: {}]   ;;  %s3099_s1 = inlined_call_operand.vmem [shape: bf16[8,24], index: 1, kind: input, shape index: {}]   ;;  %s3100_s2 = inlined_call_operand.vmem [shape: f32[24,1], index: 2, kind: input, shape index: {}]   ;;  %s3101_s3 = inlined_call_operand.vmem [shape: bf16[3,32,32], index: 3, kind: input, shape index: {}]   ;;  %s3102_s4 = inlined_call_operand.vmem [shape: f32[3,32,1], index: 4, kind: input, shape index: {}]   ;;  %s3103_s5 = inlined_call_operand.vmem [shape: bf16[32,32], index: 5, kind: input, shape index: {}]   ;;  %s3104_s6 = inlined_call_operand.vmem [shape: f32[32,1], index: 6, kind: input, shape index: {}]   ;;  %s3105_s7 = inlined_call_operand.vmem [shape: bf16[16,32], index: 7, kind: input, shape index: {}]   ;;  %s3106_s8 = inlined_call_operand.vmem [shape: f32[16,1], index: 8, kind: input, shape index: {}]   ;;  %s3107_s9 = inlined_call_operand.vmem [shape: f32[16,1], index: 9, kind: input, shape index: {}]   ;;  %s3108_s10 = inlined_call_operand.<no memory space> [shape: f32[1,1], index: 10, kind: input, shape index: {}]   ;;  %s3109_s11 = inlined_call_operand.hbm [shape: f32[1,1024], index: 11, kind: output, shape index: {}]  }
   0x1   :  { %v16_v0 = vstv %s3108_s10 }
   0x2   :  { %17 = vst [vmem:[#allocation2] sm:$0x1] %v16_v0 }
   0x3   :  { %18 = vsyncpa [#allocation4], 0 }
   0x4   :  { %20 = vsyncpa [#allocation4 + $0x1], 0  ;;  %s2140_s19 = smov 0   ;;  %s2142_s20 = smov 0  }
   0x5   :  { %s2144_s21 = smov 0   ;;  %s2146_s22 = smov 0  }
   0x6 LB: > { %s1808_s10 = sadd.s32 4294967295, %s2072_s22   ;;  %s1809_s23 = sadd.s32 4294967294, %s2072_s22   ;;  %s2072_s22 = sphi %s2146_s22, %s3148_s22   ;;  %s2068_s21 = sphi %s2144_s21, %s3147_s21   ;;  %s2064_s20 = sphi %s2142_s20, %s3146_s20   ;;  %s2060_s19 = sphi %s2140_s19, %s3145_s19  }
   0x7   : > { %s2163_s24 = sadd.s32 1, %s2072_s22   ;;  %s269_s25 = sadd.s32 1, %s2068_s21 }
   0x8   : > { %s266_s26 = ssub.s32 %s2072_s22, %s2163_s24  ;;  %p279_p0 = scmp.ne.s32.totalorder %s2068_s21, %s2064_s20 }
   0x9   : > { %p267_p1 = scmp.eq.s32.totalorder %s266_s26, 0  ;;  %p280_p2 = scmp.eq.s32.totalorder %s1808_s10, 1 }
   0xa   : > { %p285_p3 = scmp.ne.s32.totalorder %s2064_s20, %s2060_s19  ;;  %p286_p4 = scmp.eq.s32.totalorder %s1809_s23, 1 }
   0xb   : > { %s2173_s27 = scalar_select %p267_p1, %s2068_s21, %s269_s25  }
   0xc   : > { %p2175_p5 = por %p280_p2, %p279_p0  ;;  %p2179_p6 = por %p286_p4, %p285_p3 }
   0xd   : > { %p1812_p7 = scmp.ge.s32.totalorder %s2072_s22, 1  ;;  %p343_p8 = scmp.lt.s32.totalorder %s2072_s22, 3 }
   0xf   : > { %p344_p9 = pnand %p1812_p7, %p343_p8 }
  0x11   : > { %347 = sbr.rel (%p344_p9) target bundleno = 1090 (0x442), region = 64 }
  0x16   : > { %s2185_s30 = sshll.u32 %s1808_s10, 2  ;;  %v3110_v1 = vlaneseq  ;;  %vm442_vm0 = vcmask 1043456   ;;  %v2074_v23 = vmov 0.0   ;;  %vm438_vm5 = vcmask 195584   ;;  %v2305_v49 = vld [vmem:[%s3099_s1] sm:$0xf] }
  0x17   : > { %p384_p10 = scmp.lt.s32.totalorder %s2185_s30, 7  ;;  %v2075_v48 = vmov 1.0|1.0   ;;  %s380_s17 = sand.u32 1, %s2064_s20  }
  0x18   : > { %v2190_v2 = vshrl.u32 %v3110_v1, 7  ;;  %s1813_s18 = sshll.u32 %s380_s17, 2  ;;  %s1745_s25 = scalar_lea.hbm %s3109_s11, %s2185_s30 }
  0x19   : > { %s385_s12 = scalar_select %p384_p10, %s2185_s30, 7 }
  0x1a   : > { %v2198_v4 = vadd.s32 16, %v2190_v2  ;;  %v2203_v6 = vadd.s32 8, %v2190_v2  ;;  %s382_s26 = scalar_lea.vmem [#allocation3], %s1813_s18  ;;  %s1735_s14 = scalar_lea.sflag [#allocation4], %s380_s17 }
  0x1b   : > { %s1815_s13 = sshll.u32 %s385_s12, 2  ;;  %s1747_s12 = sshll.u32 %s382_s26, 4  ;;  %s1748_s12 = int_to_ptr.vmem [resolvable:$true] %s1747_s12 }
  0x1c   : > { %s387_s16 = scalar_lea.vmem %s3098_s0, %s1815_s13  ;;  %s1749_s13 = sshll.u32 %s1745_s25, 4  ;;  %s1750_s13 = int_to_ptr.hbm [resolvable:$true] %s1749_s13 }
  0x1d   : > { %v2195_v3 = vld [vmem:[%s387_s16] sm:$0xff]  ;;  %v2200_v5 = vld [vmem:[%s387_s16 + $0x8] sm:$0xff]  ;;  %s2024_s15 = sshra.s32 %s1750_s13, 4  ;;  %s2030_s10 = scalar_lea.hbm %s3109_s11, 8  ;;  %s2025_s15 = int_to_ptr.hbm [resolvable:$true] %s2024_s15 }
  0x1e   : > { %v398_v7 = vperm.slane %v2195_v3, 0  ;;  %v399_v8 = vperm.slane %v2195_v3, 4  ;;  %v400_v9 = vperm.slane %v2200_v5, 0  ;;  %v401_v10 = vperm.slane %v2200_v5, 4  ;;  %s2026_s30 = scalar_lea.hbm %s2025_s15, 4  ;;  %p2031_p0 = scmp.lt.s32.totalorder %s2025_s15, %s3109_s11 }
  0x1f   : > { %v519_v11 = vperm.slane %v2195_v3, 1  ;;  %v635_v12 = vperm.slane %v2195_v3, 2  ;;  %v520_v13 = vperm.slane %v2195_v3, 5  ;;  %v636_v14 = vperm.slane %v2195_v3, 6  ;;  %p2027_p11 = scmp.ne.s32.totalorder %s2025_s15, %s2026_s30  ;;  %p2032_p1 = scmp.lt.s32.totalorder %s2030_s10, %s2026_s30 }
  0x20   : > { %v402_v15 = vperm.slane %v398_v7, 0  ;;  %v403_v16 = vperm.slane %v399_v8, 0  ;;  %v404_v17 = vperm.slane %v400_v9, 0  ;;  %v405_v18 = vperm.slane %v401_v10, 0 }
  0x21   : > { %v2213_v19 = vperm.slane %v519_v11, 1  ;;  %v2215_v20 = vperm.slane %v635_v12, 2  ;;  %v2217_v21 = vperm.slane %v520_v13, 1  ;;  %v2219_v22 = vperm.slane %v636_v14, 2  ;;  %p2028_p12 = pnand %p2027_p11, %p2175_p5  ;;  %p2033_p2 = por %p2032_p1, %p2031_p0 }
  0x22   : > { %vm414_vm1 = vcmp.eq.s32.totalorder %v2198_v4, %v402_v15  ;;  %vm415_vm2 = vcmp.eq.s32.totalorder %v2198_v4, %v403_v16  ;;  %vm416_vm3 = vcmp.eq.s32.totalorder %v2198_v4, %v404_v17  ;;  %vm417_vm4 = vcmp.eq.s32.totalorder %v2198_v4, %v405_v18 }
  0x23   : > { %v426_v24 = vsel %vm414_vm1, 1.0, %v2074_v23  ;;  %v427_v25 = vsel %vm415_vm2, 1.0, %v2074_v23  ;;  %v2228_v26 = vsel %vm416_vm3, 1.0, %v2074_v23  ;;  %v2231_v27 = vsel %vm417_vm4, 1.0, %v2074_v23  ;;  %p2029_p13 = pneg %p2028_p12 }
  0x24   : > { %v434_v28 = vpack.c.bf16 %v426_v24, %v426_v24  ;;  %v435_v29 = vpack.c.bf16 %v427_v25, %v427_v25  ;;  %v436_v30 = vpack.c.bf16 %v2228_v26, %v2228_v26  ;;  %v437_v31 = vpack.c.bf16 %v2231_v27, %v2231_v27 }
  0x25   : > { %vm406_vm6 = vcmp.eq.s32.totalorder %v2190_v2, %v402_v15  ;;  %vm410_vm7 = vcmp.eq.s32.totalorder %v2203_v6, %v402_v15  ;;  %vm407_vm8 = vcmp.eq.s32.totalorder %v2190_v2, %v403_v16  ;;  %vm411_vm9 = vcmp.eq.s32.totalorder %v2203_v6, %v403_v16  ;;  %p2034_p3 = pnand %p2033_p2, %p2029_p13 }
  0x26   : > { %v444_v32 = vsel %vm442_vm0, %v434_v28, 0  ;;  %v447_v33 = vsel %vm442_vm0, %v435_v29, 0  ;;  %v450_v34 = vsel %vm442_vm0, %v436_v30, 0  ;;  %v453_v35 = vsel %vm442_vm0, %v437_v31, 0  ;;  %vm2251_vm10 = vmpackc.low %vm410_vm7, %vm406_vm6 }
  0x27   : > { %461 = vmatpush.bf16.msra.mxu0 %v444_v32  ;;  %474 = vmatpush.bf16.msra.mxu1 %v447_v33  ;;  %v2246_v36 = vsel %vm406_vm6, 1.0, %v2074_v23  ;;  %v2249_v37 = vsel %vm410_vm7, 1.0, %v2074_v23  ;;  %v2258_v39 = vsel %vm407_vm8, 1.0, %v2074_v23  ;;  %v2261_v40 = vsel %vm411_vm9, 1.0, %v2074_v23  ;;  %vm2265_vm11 = vmpackc.low %vm411_vm9, %vm407_vm8 }
  0x28   : > { %487 = vmatpush.bf16.msra.mxu2 %v450_v34  ;;  %500 = vmatpush.bf16.msra.mxu3 %v453_v35  ;;  %vm408_vm12 = vcmp.eq.s32.totalorder %v2190_v2, %v404_v17  ;;  %vm412_vm13 = vcmp.eq.s32.totalorder %v2203_v6, %v404_v17  ;;  %vm409_vm14 = vcmp.eq.s32.totalorder %v2190_v2, %v405_v18  ;;  %v521_v42 = vperm.slane %v2200_v5, 1 }
  0x29   : > { %v2274_v43 = vsel %vm408_vm12, 1.0, %v2074_v23  ;;  %v2277_v44 = vsel %vm412_vm13, 1.0, %v2074_v23  ;;  %vm2279_vm15 = vmpackc.low %vm412_vm13, %vm408_vm12  ;;  %vm413_vm1 = vcmp.eq.s32.totalorder %v2203_v6, %v405_v18  ;;  %v2285_v46 = vsel %vm409_vm14, 1.0, %v2074_v23 }
  0x2a   : > { %v2288_v47 = vsel %vm413_vm1, 1.0, %v2074_v23  ;;  %vm1825_vm2 = vmpackc.low %vm413_vm1, %vm409_vm14  ;;  %vm535_vm3 = vcmp.eq.s32.totalorder %v2198_v4, %v2213_v19  ;;  %vm651_vm4 = vcmp.eq.s32.totalorder %v2198_v4, %v2215_v20  ;;  %vm536_vm6 = vcmp.eq.s32.totalorder %v2198_v4, %v2217_v21 }
  0x2b   : > { %1817 = vmatpush.bf16.msk.msra.mxu0 %vm2251_vm10, %v2075_v48  ;;  %1820 = vmatpush.bf16.msk.msra.mxu1 %vm2265_vm11, %v2075_v48  ;;  %v547_v50 = vsel %vm535_vm3, 1.0, %v2074_v23  ;;  %v2309_v51 = vsel %vm651_vm4, 1.0, %v2074_v23  ;;  %v548_v52 = vsel %vm536_vm6, 1.0, %v2074_v23  ;;  %vm652_vm7 = vcmp.eq.s32.totalorder %v2198_v4, %v2219_v22 }
  0x2c   : > { %1823 = vmatpush.bf16.msk.msra.mxu2 %vm2279_vm15, %v2075_v48  ;;  %1826 = vmatpush.bf16.msk.msra.mxu3 %vm1825_vm2, %v2075_v48  ;;  %v555_v53 = vpack.c.bf16 %v547_v50, %v547_v50  ;;  %v631_v54 = vadd.f32 %v547_v50, %v426_v24  ;;  %v556_v55 = vpack.c.bf16 %v548_v52, %v548_v52  ;;  %v2319_v56 = vsel %vm652_vm7, 1.0, %v2074_v23 }
  0x2d   : > { %v632_v57 = vadd.f32 %v548_v52, %v427_v25  ;;  %v525_v58 = vperm.slane %v521_v42, 1  ;;  %v637_v59 = vperm.slane %v2200_v5, 2  ;;  %v522_v60 = vperm.slane %v2200_v5, 5 }
  0x2e   : > { %1818 = vmatmul.msk.bf16.vlgmr.msra.gmra.mxu0 %vm438_vm5, %v2305_v49  ;;  %1821 = vmatmul.msk.bf16.vlgmr.msra.gmra.mxu1 %vm438_vm5, %v2305_v49  ;;  %v560_v61 = vsel %vm442_vm0, %v555_v53, 0  ;;  %v2329_v62 = vadd.f32 %v2309_v51, %v631_v54  ;;  %v563_v63 = vsel %vm442_vm0, %v556_v55, 0  ;;  %v638_v0 = vperm.slane %v2200_v5, 6 }
  0x2f   : > { %1824 = vmatmul.msk.bf16.vlgmr.msra.gmra.mxu2 %vm438_vm5, %v2305_v49  ;;  %1827 = vmatmul.msk.bf16.vlgmr.msra.gmra.mxu3 %vm438_vm5, %v2305_v49  ;;  %v2338_v7 = vadd.f32 %v2319_v56, %v632_v57  ;;  %vm537_vm8 = vcmp.eq.s32.totalorder %v2198_v4, %v525_v58  ;;  %v2341_v8 = vperm.slane %v637_v59, 2  ;;  %v526_v9 = vperm.slane %v522_v60, 1 }
  0x30   : > { %577 = vmatpush.bf16.msrb.mxu0 %v560_v61  ;;  %590 = vmatpush.bf16.msrb.mxu1 %v563_v63  ;;  %v549_v10 = vsel %vm537_vm8, 1.0, %v2074_v23  ;;  %v2344_v11 = vperm.slane %v638_v0, 2  ;;  %vm527_vm9 = vcmp.eq.s32.totalorder %v2190_v2, %v2213_v19  ;;  %vm531_vm10 = vcmp.eq.s32.totalorder %v2203_v6, %v2213_v19 }
  0x31   : > { %v557_v12 = vpack.c.bf16 %v549_v10, %v549_v10  ;;  %v633_v13 = vadd.f32 %v549_v10, %v2228_v26  ;;  %vm653_vm11 = vcmp.eq.s32.totalorder %v2198_v4, %v2341_v8  ;;  %vm538_vm12 = vcmp.eq.s32.totalorder %v2198_v4, %v526_v9  ;;  %vm1828_vm13 = vmpackc.low %vm531_vm10, %vm527_vm9 }
  0x32   : > { %v665_v14 = vsel %vm653_vm11, 1.0, %v2074_v23  ;;  %v550_v15 = vsel %vm538_vm12, 1.0, %v2074_v23  ;;  %vm654_vm14 = vcmp.eq.s32.totalorder %v2198_v4, %v2344_v11  ;;  %v539_v16 = vsel %vm527_vm9, 1.0, %v2074_v23 }
  0x33   : > { %v566_v17 = vsel %vm442_vm0, %v557_v12, 0  ;;  %v2363_v18 = vadd.f32 %v665_v14, %v633_v13  ;;  %v558_v24 = vpack.c.bf16 %v550_v15, %v550_v15  ;;  %v634_v25 = vadd.f32 %v550_v15, %v2231_v27 }
  0x34   : > { %603 = vmatpush.bf16.msrb.mxu2 %v566_v17  ;;  %v666_v26 = vsel %vm654_vm14, 1.0, %v2074_v23  ;;  %v543_v28 = vsel %vm531_vm10, 1.0, %v2074_v23  ;;  %1829 = vmatpush.bf16.msk.msrb.mxu0 %vm1828_vm13, %v2075_v48  ;;  %v623_v29 = vadd.f32 %v539_v16, %v2246_v36  ;;  %vm528_vm15 = vcmp.eq.s32.totalorder %v2190_v2, %v2217_v21 }
  0x35   : > { %v569_v30 = vsel %vm442_vm0, %v558_v24, 0  ;;  %v2376_v31 = vadd.f32 %v666_v26, %v634_v25  ;;  %v627_v27 = vadd.f32 %v543_v28, %v2249_v37  ;;  %vm532_vm1 = vcmp.eq.s32.totalorder %v2203_v6, %v2217_v21 }
  0x36   : > { %616 = vmatpush.bf16.msrb.mxu3 %v569_v30  ;;  %v540_v19 = vsel %vm528_vm15, 1.0, %v2074_v23  ;;  %v544_v32 = vsel %vm532_vm1, 1.0, %v2074_v23  ;;  %vm1831_vm2 = vmpackc.low %vm532_vm1, %vm528_vm15  ;;  %vm529_vm3 = vcmp.eq.s32.totalorder %v2190_v2, %v525_v58  ;;  %vm533_vm4 = vcmp.eq.s32.totalorder %v2203_v6, %v525_v58 }
  0x37   : > { %1832 = vmatpush.bf16.msk.msrb.mxu1 %vm1831_vm2, %v2075_v48  ;;  %v624_v33 = vadd.f32 %v540_v19, %v2258_v39  ;;  %v628_v34 = vadd.f32 %v544_v32, %v2261_v40  ;;  %v541_v35 = vsel %vm529_vm3, 1.0, %v2074_v23  ;;  %v545_v21 = vsel %vm533_vm4, 1.0, %v2074_v23  ;;  %vm1834_vm6 = vmpackc.low %vm533_vm4, %vm529_vm3 }
  0x38   : > { %1835 = vmatpush.bf16.msk.msrb.mxu2 %vm1834_vm6, %v2075_v48  ;;  %v625_v36 = vadd.f32 %v541_v35, %v2274_v43  ;;  %v629_v37 = vadd.f32 %v545_v21, %v2277_v44  ;;  %vm530_vm7 = vcmp.eq.s32.totalorder %v2190_v2, %v526_v9  ;;  %vm534_vm8 = vcmp.eq.s32.totalorder %v2203_v6, %v526_v9 }
  0x39   : > { %v542_v38 = vsel %vm530_vm7, 1.0, %v2074_v23  ;;  %v546_v39 = vsel %vm534_vm8, 1.0, %v2074_v23  ;;  %vm1837_vm9 = vmpackc.low %vm534_vm8, %vm530_vm7  ;;  %v671_v40 = vpack.c.bf16 %v2309_v51, %v2309_v51  ;;  %v672_v41 = vpack.c.bf16 %v2319_v56, %v2319_v56 }
  0x3a   : > { %1838 = vmatpush.bf16.msk.msrb.mxu3 %vm1837_vm9, %v2075_v48  ;;  %v626_v42 = vadd.f32 %v542_v38, %v2285_v46  ;;  %v630_v43 = vadd.f32 %v546_v39, %v2288_v47  ;;  %v673_v44 = vpack.c.bf16 %v665_v14, %v665_v14  ;;  %v674_v45 = vpack.c.bf16 %v666_v26, %v666_v26 }
  0x3b   : > { %v676_v50 = vsel %vm442_vm0, %v671_v40, 0  ;;  %v679_v52 = vsel %vm442_vm0, %v672_v41, 0  ;;  %vm643_vm10 = vcmp.eq.s32.totalorder %v2190_v2, %v2215_v20  ;;  %vm647_vm11 = vcmp.eq.s32.totalorder %v2203_v6, %v2215_v20 }
  0x3c   : > { %693 = vmatpush.bf16.msra.mxu0 %v676_v50  ;;  %706 = vmatpush.bf16.msra.mxu1 %v679_v52  ;;  %v682_v51 = vsel %vm442_vm0, %v673_v44, 0  ;;  %v685_v46 = vsel %vm442_vm0, %v674_v45, 0  ;;  %v655_v47 = vsel %vm643_vm10, 1.0, %v2074_v23  ;;  %v659_v53 = vsel %vm647_vm11, 1.0, %v2074_v23  ;;  %vm2414_vm12 = vmpackc.low %vm647_vm11, %vm643_vm10 }
  0x3d   : > { %719 = vmatpush.bf16.msra.mxu2 %v682_v51  ;;  %v2418_v55 = vadd.f32 %v655_v47, %v623_v29  ;;  %v2420_v56 = vadd.f32 %v659_v53, %v627_v27  ;;  %vm644_vm13 = vcmp.eq.s32.totalorder %v2190_v2, %v2219_v22  ;;  %v751_v20 = vperm.slane %v2195_v3, 3 }
  0x3e   : > { %732 = vmatpush.bf16.msra.mxu3 %v685_v46  ;;  %1830 = vmatmul.msk.bf16.vlgmr.msrb.gmra.mxu0 %vm438_vm5, %v2305_v49  ;;  %vm648_vm14 = vcmp.eq.s32.totalorder %v2203_v6, %v2219_v22  ;;  %v656_v57 = vsel %vm644_vm13, 1.0, %v2074_v23  ;;  %vm645_vm15 = vcmp.eq.s32.totalorder %v2190_v2, %v2341_v8  ;;  %vm649_vm1 = vcmp.eq.s32.totalorder %v2203_v6, %v2341_v8 }
  0x3f   : > { %1833 = vmatmul.msk.bf16.vlgmr.msrb.gmra.mxu1 %vm438_vm5, %v2305_v49  ;;  %1836 = vmatmul.msk.bf16.vlgmr.msrb.gmra.mxu2 %vm438_vm5, %v2305_v49  ;;  %v660_v58 = vsel %vm648_vm14, 1.0, %v2074_v23  ;;  %vm1843_vm2 = vmpackc.low %vm648_vm14, %vm644_vm13  ;;  %v2441_v59 = vadd.f32 %v656_v57, %v624_v33  ;;  %v657_v22 = vsel %vm645_vm15, 1.0, %v2074_v23  ;;  %v661_v60 = vsel %vm649_vm1, 1.0, %v2074_v23 }
  0x40   : > { %1839 = vmatmul.msk.bf16.vlgmr.msrb.gmra.mxu3 %vm438_vm5, %v2305_v49  ;;  %1841 = vmatpush.bf16.msk.msra.mxu0 %vm2414_vm12, %v2075_v48  ;;  %v744_v61 = vadd.f32 %v660_v58, %v628_v34  ;;  %vm1846_vm3 = vmpackc.low %vm649_vm1, %vm645_vm15  ;;  %v741_v63 = vadd.f32 %v657_v22, %v625_v36  ;;  %v745_v0 = vadd.f32 %v661_v60, %v629_v37  ;;  %v755_v8 = vperm.slane %v751_v20, 3  ;;  %v942_v22 = vld [vmem:[%s3102_s4 + $0x8] sm:$0xff] }
  0x41   : > { %1844 = vmatpush.bf16.msk.msra.mxu1 %vm1843_vm2, %v2075_v48  ;;  %1847 = vmatpush.bf16.msk.msra.mxu2 %vm1846_vm3, %v2075_v48  ;;  %vm646_vm4 = vcmp.eq.s32.totalorder %v2190_v2, %v2344_v11  ;;  %vm650_vm6 = vcmp.eq.s32.totalorder %v2203_v6, %v2344_v11  ;;  %v752_v9 = vperm.slane %v2195_v3, 7  ;;  %v753_v10 = vperm.slane %v2200_v5, 3 }
  0x42   : > { %v658_v12 = vsel %vm646_vm4, 1.0, %v2074_v23  ;;  %v662_v13 = vsel %vm650_vm6, 1.0, %v2074_v23  ;;  %vm1849_vm7 = vmpackc.low %vm650_vm6, %vm646_vm4  ;;  %vm767_vm8 = vcmp.eq.s32.totalorder %v2198_v4, %v755_v8  ;;  %v754_v14 = vperm.slane %v2200_v5, 7 }
  0x43   : > { %1850 = vmatpush.bf16.msk.msra.mxu3 %vm1849_vm7, %v2075_v48  ;;  %v742_v15 = vadd.f32 %v658_v12, %v626_v42  ;;  %v746_v16 = vadd.f32 %v662_v13, %v630_v43  ;;  %v779_v17 = vsel %vm767_vm8, 1.0, %v2074_v23  ;;  %v756_v11 = vperm.slane %v752_v9, 3  ;;  %v1885_v9 = vld [vmem:[%s3102_s4 + $0x28] sm:$0xff] }
  0x44   : > { %v787_v24 = vpack.c.bf16 %v779_v17, %v779_v17  ;;  %v2463_v3 = vadd.f32 %v779_v17, %v2329_v62  ;;  %v757_v25 = vperm.slane %v753_v10, 3  ;;  %v758_v26 = vperm.slane %v754_v14, 3  ;;  %v1886_v17 = vld [vmem:[%s3102_s4 + $0x30] sm:$0xff] }
  0x45   : > { %vm768_vm9 = vcmp.eq.s32.totalorder %v2198_v4, %v756_v11  ;;  %vm759_vm10 = vcmp.eq.s32.totalorder %v2190_v2, %v755_v8  ;;  %vm763_vm11 = vcmp.eq.s32.totalorder %v2203_v6, %v755_v8  ;;  %vm760_vm12 = vcmp.eq.s32.totalorder %v2190_v2, %v756_v11 }
  0x46   : > { %v792_v5 = vsel %vm442_vm0, %v787_v24, 0  ;;  %v780_v28 = vsel %vm768_vm9, 1.0, %v2074_v23  ;;  %vm769_vm13 = vcmp.eq.s32.totalorder %v2198_v4, %v757_v25  ;;  %vm770_vm14 = vcmp.eq.s32.totalorder %v2198_v4, %v758_v26  ;;  %vm1852_vm15 = vmpackc.low %vm763_vm11, %vm759_vm10 }
  0x47   : > { %809 = vmatpush.bf16.msrb.mxu0 %v792_v5  ;;  %v788_v62 = vpack.c.bf16 %v780_v28, %v780_v28  ;;  %v2474_v29 = vadd.f32 %v780_v28, %v2338_v7  ;;  %v781_v30 = vsel %vm769_vm13, 1.0, %v2074_v23  ;;  %v782_v27 = vsel %vm770_vm14, 1.0, %v2074_v23  ;;  %v1429_v28 = vld [vmem:[%s3104_s6 + $0x18] sm:$0xff] }
  0x48   : > { %v789_v19 = vpack.c.bf16 %v781_v30, %v781_v30  ;;  %v2479_v32 = vadd.f32 %v781_v30, %v2363_v18  ;;  %v790_v33 = vpack.c.bf16 %v782_v27, %v782_v27  ;;  %v2482_v34 = vadd.f32 %v782_v27, %v2376_v31 }
  0x49   : > { %v795_v35 = vsel %vm442_vm0, %v788_v62, 0  ;;  %v771_v4 = vsel %vm759_vm10, 1.0, %v2074_v23  ;;  %v775_v7 = vsel %vm763_vm11, 1.0, %v2074_v23  ;;  %vm764_vm1 = vcmp.eq.s32.totalorder %v2203_v6, %v756_v11  ;;  %v1887_v62 = vld [vmem:[%s3102_s4 + $0x38] sm:$0xff] }
  0x4a   : > { %822 = vmatpush.bf16.msrb.mxu1 %v795_v35  ;;  %v798_v18 = vsel %vm442_vm0, %v789_v19, 0  ;;  %v801_v31 = vsel %vm442_vm0, %v790_v33, 0  ;;  %v2499_v21 = vadd.f32 %v771_v4, %v2418_v55  ;;  %v2502_v36 = vadd.f32 %v775_v7, %v2420_v56  ;;  %vm2513_vm0 = vmpackc.low %vm764_vm1, %vm760_vm12  ;;  %v943_v55 = vld [vmem:[%s3102_s4 + $0x10] sm:$0xff]  ;;  %v1427_v7 = vld [vmem:[%s3104_s6 + $0x8] sm:$0xff] }
  0x4b   : > { %835 = vmatpush.bf16.msrb.mxu2 %v798_v18  ;;  %848 = vmatpush.bf16.msrb.mxu3 %v801_v31  ;;  %v772_v37 = vsel %vm760_vm12, 1.0, %v2074_v23  ;;  %v776_v38 = vsel %vm764_vm1, 1.0, %v2074_v23  ;;  %vm761_vm2 = vcmp.eq.s32.totalorder %v2190_v2, %v757_v25  ;;  %vm765_vm3 = vcmp.eq.s32.totalorder %v2203_v6, %v757_v25  ;;  %v1428_v25 = vld [vmem:[%s3104_s6 + $0x10] sm:$0xff]  ;;  %v1568_v18 = vld [vmem:[%s3106_s8] sm:$0xff] }
  0x4c   : > { %1853 = vmatpush.bf16.msk.msrb.mxu0 %vm1852_vm15, %v2075_v48  ;;  %v2518_v40 = vadd.f32 %v772_v37, %v2441_v59  ;;  %v2520_v41 = vadd.f32 %v776_v38, %v744_v61  ;;  %v773_v42 = vsel %vm761_vm2, 1.0, %v2074_v23  ;;  %v777_v43 = vsel %vm765_vm3, 1.0, %v2074_v23  ;;  %vm1858_vm4 = vmpackc.low %vm765_vm3, %vm761_vm2  ;;  %v944_v59 = vld [vmem:[%s3102_s4 + $0x18] sm:$0xff]  ;;  %v1910_v31 = vld [vmem:[%s3102_s4 + $0x50] sm:$0xff] }
  0x4d   : > { %v2524_v44 = vadd.f32 %v773_v42, %v741_v63  ;;  %v2526_v45 = vadd.f32 %v777_v43, %v745_v0  ;;  %vm762_vm6 = vcmp.eq.s32.totalorder %v2190_v2, %v758_v26  ;;  %vm766_vm7 = vcmp.eq.s32.totalorder %v2203_v6, %v758_v26  ;;  %v1884_v63 = vld [vmem:[%s3102_s4 + $0x20] sm:$0xff] }
  0x4e   : > { %1842 = vmatmul.msk.bf16.vlgmr.msra.gmra.mxu0 %vm438_vm5, %v2305_v49  ;;  %v774_v50 = vsel %vm762_vm6, 1.0, %v2074_v23  ;;  %v778_v52 = vsel %vm766_vm7, 1.0, %v2074_v23  ;;  %vm1861_vm8 = vmpackc.low %vm766_vm7, %vm762_vm6  ;;  %1856 = vmatpush.bf16.msk.msrb.mxu1 %vm2513_vm0, %v2075_v48  ;;  %v2076_v54 = vmov 0   ;;  %v1956_v43 = vld [vmem:[%s3101_s3] sm:$0xff]  ;;  %vm1722_vm9 = vcmask 1040384  }
  0x4f   : > { %1845 = vmatmul.msk.bf16.vlgmr.msra.gmra.mxu1 %vm438_vm5, %v2305_v49  ;;  %1848 = vmatmul.msk.bf16.vlgmr.msra.gmra.mxu2 %vm438_vm5, %v2305_v49  ;;  %v2540_v2 = vadd.f32 %v774_v50, %v742_v15  ;;  %v2542_v6 = vadd.f32 %v778_v52, %v746_v16  ;;  %v1911_v15 = vld [vmem:[%s3102_s4 + $0x58] sm:$0xff]  ;;  %v1908_v16 = vld [vmem:[%s3102_s4 + $0x40] sm:$0xff]  ;;  %vm1724_vm10 = vcmask 1042434   ;;  %vm1726_vm11 = vcmask 1041408  }
  0x50   : > { %1851 = vmatmul.msk.bf16.vlgmr.msra.gmra.mxu3 %vm438_vm5, %v2305_v49  ;;  %1859 = vmatpush.bf16.msk.msrb.mxu2 %vm1858_vm4, %v2075_v48 }
  0x51   : > { %1862 = vmatpush.bf16.msk.msrb.mxu3 %vm1861_vm8, %v2075_v48  ;;  %2007 = vset.pattern.permute.xlu0 %v2076_v54 }
  0x52   : > { %2008 = vset.pattern.permute.xlu1 %v2076_v54  ;;  %957 = vperm.xlu0 %2007, %v943_v55   ;;  %v868_v55 = vld [vmem:[%s3100_s2 + $0x8] sm:$0xff] }
  0x53   : > { %2009 = vset.pattern.permute.xlu2 %v2076_v54  ;;  %v867_v54 = vld [vmem:[%s3100_s2] sm:$0xff] }
  0x54   : > { %1120 = vperm.xlu2 %2009, %v1886_v17  }
  0x5a   : > { %962 = vperm.xlu0 %2007, %v944_v59  }
  0x5c   : > { %1125 = vperm.xlu2 %2009, %v1887_v62  }
  0x5e   : > { %1854 = vmatmul.msk.bf16.vlgmr.msrb.gmra.mxu0 %vm438_vm5, %v2305_v49 }
  0x5f   : > { %1857 = vmatmul.msk.bf16.vlgmr.msrb.gmra.mxu1 %vm438_vm5, %v2305_v49  ;;  %1860 = vmatmul.msk.bf16.vlgmr.msrb.gmra.mxu2 %vm438_vm5, %v2305_v49 }
  0x60   : > { %1863 = vmatmul.msk.bf16.vlgmr.msrb.gmra.mxu3 %vm438_vm5, %v2305_v49  ;;  %v941_v49 = vld [vmem:[%s3102_s4] sm:$0xff]  ;;  %vm975_vm5 = vcmask 261120  }
  0x61   : > { %947 = vperm.xlu1 %2008, %v941_v49   ;;  %v1909_v49 = vld [vmem:[%s3102_s4 + $0x48] sm:$0xff] }
  0x62   : > { %1110 = vperm.xlu0 %2007, %v1884_v63   ;;  %v1652_v63 = vld [vmem:[%s3107_s9] sm:$0xff] }
  0x64   : > { %1282 = vperm.xlu2 %2009, %v1910_v31  }
  0x69   : > { %952 = vperm.xlu1 %2008, %v942_v22  }
  0x6a   : > { %1287 = vperm.xlu0 %2007, %v1911_v15  }
  0x6c   : > { %1277 = vperm.xlu2 %2009, %v1909_v49  }
  0x71   : > { %1115 = vperm.xlu1 %2008, %v1885_v9   ;;  %v1957_v9 = vld [vmem:[%s3101_s3 + $0x8] sm:$0xff] }
  0x72   : > { %1442 = vperm.xlu0 %2007, %v1428_v25  }
  0x79   : > { %1272 = vperm.xlu1 %2008, %v1908_v16  }
  0x7a   : > { %1437 = vperm.xlu0 %2007, %v1427_v7  }
  0x81   : > { %1447 = vperm.xlu1 %2008, %v1429_v28  }
  0x82   : > { %872 = vperm.xlu0 %2007, %v867_v54  }
  0x89   : > { %1572 = vperm.xlu1 %2008, %v1568_v18  }
  0x8a   : > { %1656 = vperm.xlu0 %2007, %v1652_v63  }
  0x91   : > { %877 = vperm.xlu1 %2008, %v868_v55  }
  0xab   : > { %v2557_v23 = vpop.f32.mrf.mxu0  ;;  %v2559_v51 = vpop.f32.mrf.mxu1 }
  0xae   : > { %v2692_v17 = vpop.permute.xlu2 %1120 }
  0xb2   : > { %v2561_v46 = vpop.f32.mrf.mxu2  ;;  %v2563_v47 = vpop.f32.mrf.mxu3 }
  0xb3   : > { %v466_v48 = vpop.f32.mrf.mxu0  ;;  %v479_v53 = vpop.f32.mrf.mxu1 }
  0xba   : > { %v492_v56 = vpop.f32.mrf.mxu2  ;;  %v505_v20 = vpop.f32.mrf.mxu3 }
  0xbb   : > { %v2571_v57 = vpop.f32.mrf.mxu0 }
  0xbc   : > { %v2573_v58 = vpop.f32.mrf.mxu1  ;;  %v933_v37 = vpack.c.bf16 %v2571_v57, %v2557_v23 }
  0xbd   : > { %v934_v38 = vpack.c.bf16 %v2573_v58, %v2559_v51 }
  0xc2   : > { %v2581_v60 = vpop.f32.mrf.mxu2 }
  0xc3   : > { %v2583_v61 = vpop.f32.mrf.mxu3  ;;  %v582_v0 = vpop.f32.mrf.mxu0  ;;  %v935_v56 = vpack.c.bf16 %v2581_v60, %v2561_v46 }
  0xc4   : > { %v595_v8 = vpop.f32.mrf.mxu1  ;;  %v936_v20 = vpack.c.bf16 %v2583_v61, %v2563_v47  ;;  %v1653_v0 = vld [vmem:[%s3107_s9 + $0x8] sm:$0xff]  ;;  %v2688_v15 = vpop.permute.xlu0 %957 }
  0xc5   : > { %v1426_v8 = vld [vmem:[%s3104_s6] sm:$0xff]  ;;  %1661 = vperm.xlu1 %2008, %v1653_v0  }
  0xc6   : > { %1432 = vperm.xlu2 %2009, %v1426_v8  }
  0xca   : > { %v608_v10 = vpop.f32.mrf.mxu2 }
  0xcb   : > { %v621_v12 = vpop.f32.mrf.mxu3  ;;  %v2591_v13 = vpop.f32.mrf.mxu0  ;;  %v1569_v10 = vld [vmem:[%s3106_s8 + $0x8] sm:$0xff] }
  0xcc   : > { %v2593_v14 = vpop.f32.mrf.mxu1  ;;  %v869_v12 = vld [vmem:[%s3100_s2 + $0x10] sm:$0xff]  ;;  %v2694_v25 = vpop.permute.xlu0 %962 }
  0xce   : > { %1577 = vperm.xlu2 %2009, %v1569_v10  }
  0xd2   : > { %v2604_v11 = vpop.f32.mrf.mxu2 }
  0xd3   : > { %v2606_v24 = vpop.f32.mrf.mxu3  ;;  %v698_v26 = vpop.f32.mrf.mxu0 }
  0xd4   : > { %v711_v5 = vpop.f32.mrf.mxu1  ;;  %v2690_v16 = vpop.permute.xlu1 %947 }
  0xd5   : > { %v2698_v5 = vpop.permute.xlu2 %1125  ;;  %v2700_v28 = vpop.permute.xlu0 %1110 }
  0xd6   : > { %882 = vperm.xlu2 %2009, %v869_v12  }
  0xda   : > { %v724_v30 = vpop.f32.mrf.mxu2 }
  0xdb   : > { %v737_v27 = vpop.f32.mrf.mxu3  ;;  %v2617_v19 = vpop.f32.mrf.mxu0 }
  0xdc   : > { %v2619_v33 = vpop.f32.mrf.mxu1  ;;  %v937_v35 = vpack.c.bf16 %v2617_v19, %v2591_v13  ;;  %v2696_v26 = vpop.permute.xlu1 %952 }
  0xdd   : > { %v938_v4 = vpack.c.bf16 %v2619_v33, %v2593_v14  ;;  %v2704_v30 = vpop.permute.xlu2 %1282  ;;  %v2706_v27 = vpop.permute.xlu0 %1287 }
  0xde   : > { %988 = vmatpush.bf16.msra.mxu0 %v937_v35 }
  0xdf   : > { %1007 = vmatpush.bf16.msra.mxu1 %v938_v4 }
  0xe2   : > { %v2638_v39 = vpop.f32.mrf.mxu2  ;;  %989 = vmatpush.bf16.msra.mxu0 %v933_v37 }
  0xe3   : > { %v2640_v42 = vpop.f32.mrf.mxu3  ;;  %1008 = vmatpush.bf16.msra.mxu1 %v934_v38  ;;  %v939_v50 = vpack.c.bf16 %v2638_v39, %v2604_v11  ;;  %v814_v53 = vpop.f32.mrf.mxu0 }
  0xe4   : > { %v940_v52 = vpack.c.bf16 %v2640_v42, %v2606_v24  ;;  %v827_v48 = vpop.f32.mrf.mxu1  ;;  %v2702_v62 = vpop.permute.xlu1 %1115 }
  0xe5   : > { %1026 = vmatpush.bf16.msra.mxu2 %v939_v50  ;;  %1872 = vmatmul.msk.bf16.vlgmr.msra.gmra.mxu0 %vm975_vm5, %v1956_v43  ;;  %v2710_v4 = vpop.permute.xlu2 %1277  ;;  %v2712_v7 = vpop.permute.xlu0 %1442 }
  0xe6   : > { %1045 = vmatpush.bf16.msra.mxu3 %v940_v52  ;;  %1874 = vmatmul.msk.bf16.vlgmr.msra.gmra.mxu1 %vm975_vm5, %v1956_v43 }
  0xe9   : > { %1027 = vmatpush.bf16.msra.mxu2 %v935_v56 }
  0xea   : > { %1046 = vmatpush.bf16.msra.mxu3 %v936_v20  ;;  %v840_v59 = vpop.f32.mrf.mxu2 }
  0xeb   : > { %v853_v22 = vpop.f32.mrf.mxu3 }
  0xec   : > { %1876 = vmatmul.msk.bf16.vlgmr.msra.gmra.mxu2 %vm975_vm5, %v1956_v43  ;;  %v2708_v35 = vpop.permute.xlu1 %1272 }
  0xed   : > { %1878 = vmatmul.msk.bf16.vlgmr.msra.gmra.mxu3 %vm975_vm5, %v1956_v43  ;;  %v2718_v37 = vpop.permute.xlu0 %1437 }
  0xf4   : > { %v2714_v18 = vpop.permute.xlu1 %1447 }
  0xf5   : > { %1873 = vmatmul.msk.bf16.gmra.mxu0 %vm975_vm5, %v1957_v9  ;;  %v873_v50 = vpop.permute.xlu0 %872 }
  0xf6   : > { %1875 = vmatmul.msk.bf16.gmra.mxu1 %vm975_vm5, %v1957_v9  ;;  %v885_v48 = vmul.f32 %v873_v50, %v2499_v21  ;;  %v886_v53 = vmul.f32 %v873_v50, %v2518_v40  ;;  %v887_v54 = vmul.f32 %v873_v50, %v2524_v44  ;;  %v888_v55 = vmul.f32 %v873_v50, %v2540_v2 }
  0xfc   : > { %1877 = vmatmul.msk.bf16.gmra.mxu2 %vm975_vm5, %v1957_v9  ;;  %v2720_v38 = vpop.permute.xlu1 %1572 }
  0xfd   : > { %1879 = vmatmul.msk.bf16.gmra.mxu3 %vm975_vm5, %v1957_v9  ;;  %3131 = vst [vmem:[#allocation7_spill] sm:$0xff] %v2720_v38 }
 0x104   : > { %v878_v52 = vpop.permute.xlu1 %877 }
 0x105   : > { %v889_v49 = vmul.f32 %v878_v52, %v2502_v36  ;;  %v890_v56 = vmul.f32 %v878_v52, %v2520_v41  ;;  %v891_v20 = vmul.f32 %v878_v52, %v2526_v45  ;;  %v892_v59 = vmul.f32 %v878_v52, %v2542_v6 }
 0x107   : > { %v897_v44 = vadd.f32 %v889_v49, %v885_v48  ;;  %v905_v8 = vadd.f32 %v890_v56, %v886_v53  ;;  %v913_v2 = vadd.f32 %v891_v20, %v887_v54  ;;  %v921_v9 = vadd.f32 %v892_v59, %v888_v55 }
 0x120   : > { %v2716_v31 = vpop.permute.xlu2 %1432 }
 0x121   : > { %3130 = vst [vmem:[#allocation6_spill] sm:$0xff] %v2716_v31 }
 0x128   : > { %v2722_v43 = vpop.permute.xlu2 %1577 }
 0x129   : > { %3132 = vst [vmem:[#allocation8_spill] sm:$0xff] %v2722_v43 }
 0x130   : > { %v883_v22 = vpop.permute.xlu2 %882 }
 0x131   : > { %v893_v63 = vmul.f32 %v883_v22, %v2463_v3  ;;  %v894_v0 = vmul.f32 %v883_v22, %v2474_v29  ;;  %v895_v21 = vmul.f32 %v883_v22, %v2479_v32  ;;  %v896_v40 = vmul.f32 %v883_v22, %v2482_v34 }
 0x133   : > { %v2736_v36 = vadd.f32 %v897_v44, %v893_v63  ;;  %v2738_v41 = vadd.f32 %v905_v8, %v894_v0  ;;  %v2740_v45 = vadd.f32 %v913_v2, %v895_v21  ;;  %v2742_v6 = vadd.f32 %v921_v9, %v896_v40 }
 0x135   : > { %3133 = vst [vmem:[#allocation9_spill] sm:$0xff] %v2736_v36 }
 0x136   : > { %3134 = vst [vmem:[#allocation10_spill] sm:$0xff] %v2738_v41 }
 0x137   : > { %3135 = vst [vmem:[#allocation11_spill] sm:$0xff] %v2740_v45 }
 0x138   : > { %3136 = vst [vmem:[#allocation12_spill] sm:$0xff] %v2742_v6 }
 0x162   : > { %v991_v10 = vpop.f32.mrf.mxu0 }
 0x163   : > { %v1010_v3 = vpop.f32.mrf.mxu1  ;;  %v992_v20 = vadd.f32 %v991_v10, %v2690_v16 }
 0x164   : > { %v1011_v59 = vadd.f32 %v1010_v3, %v2690_v16 }
 0x165   : > { %v1058_v3 = vmul.f32 %v992_v20, %v2557_v23 }
 0x16a   : > { %v993_v12 = vpop.f32.mrf.mxu0 }
 0x16b   : > { %v1012_v29 = vpop.f32.mrf.mxu1  ;;  %v994_v49 = vadd.f32 %v993_v12, %v2696_v26  ;;  %v1059_v12 = vmul.f32 %v1011_v59, %v2559_v51 }
 0x16c   : > { %v1013_v56 = vadd.f32 %v1012_v29, %v2696_v26 }
 0x16d   : > { %v1062_v8 = vmul.f32 %v994_v49, %v2571_v57 }
 0x16e   : > { %v1063_v2 = vmul.f32 %v1013_v56, %v2573_v58 }
 0x16f   : > { %v1029_v50 = vpop.f32.mrf.mxu2  ;;  %v2773_v56 = vadd.f32 %v1062_v8, %v2571_v57 }
 0x170   : > { %v1048_v32 = vpop.f32.mrf.mxu3  ;;  %v2776_v20 = vadd.f32 %v1063_v2, %v2573_v58 }
 0x172   : > { %v996_v52 = vpop.f32.mrf.mxu0 }
 0x173   : > { %v1015_v34 = vpop.f32.mrf.mxu1  ;;  %v997_v54 = vadd.f32 %v996_v52, %v2688_v15 }
 0x174   : > { %v1016_v55 = vadd.f32 %v1015_v34, %v2688_v15 }
 0x175   : > { %v1066_v0 = vmul.f32 %v997_v54, %v2591_v13 }
 0x176   : > { %v1067_v21 = vmul.f32 %v1016_v55, %v2593_v14 }
 0x177   : > { %v1031_v48 = vpop.f32.mrf.mxu2  ;;  %v2761_v34 = vadd.f32 %v1066_v0, %v2591_v13  ;;  %v2784_v0 = vadd.f32 %v1058_v3, %v2557_v23  ;;  %v1049_v3 = vadd.f32 %v1048_v32, %v2690_v16 }
 0x178   : > { %v1050_v53 = vpop.f32.mrf.mxu3  ;;  %v2764_v54 = vadd.f32 %v1067_v21, %v2593_v14  ;;  %v2787_v21 = vadd.f32 %v1059_v12, %v2559_v51 }
 0x179   : > { %v1051_v8 = vadd.f32 %v1050_v53, %v2696_v26  ;;  %v1095_v2 = vpack.c.bf16 %v2773_v56, %v2784_v0  ;;  %v1061_v1 = vmul.f32 %v1049_v3, %v2563_v47 }
 0x17a   : > { %v998_v22 = vpop.f32.mrf.mxu0 }
 0x17b   : > { %v1017_v63 = vpop.f32.mrf.mxu1  ;;  %v999_v40 = vadd.f32 %v998_v22, %v2694_v25 }
 0x17c   : > { %v1018_v44 = vadd.f32 %v1017_v63, %v2694_v25 }
 0x17d   : > { %v1070_v9 = vmul.f32 %v999_v40, %v2617_v19 }
 0x17e   : > { %v1071_v10 = vmul.f32 %v1018_v44, %v2619_v33  ;;  %v1032_v44 = vadd.f32 %v1031_v48, %v2696_v26  ;;  %v1958_v48 = vld [vmem:[%s3101_s3 + $0x10] sm:$0xff] }
 0x17f   : > { %v1034_v29 = vpop.f32.mrf.mxu2  ;;  %v2767_v55 = vadd.f32 %v1070_v9, %v2617_v19  ;;  %v1096_v9 = vpack.c.bf16 %v2776_v20, %v2787_v21 }
 0x180   : > { %v1053_v52 = vpop.f32.mrf.mxu3  ;;  %v2770_v49 = vadd.f32 %v1071_v10, %v2619_v33  ;;  %v1035_v63 = vadd.f32 %v1034_v29, %v2688_v15  ;;  %v1030_v10 = vadd.f32 %v1029_v50, %v2690_v16  ;;  %v1064_v16 = vmul.f32 %v1032_v44, %v2581_v60 }
 0x181   : > { %v1099_v59 = vpack.c.bf16 %v2767_v55, %v2761_v34  ;;  %v1054_v40 = vadd.f32 %v1053_v52, %v2688_v15  ;;  %v1704_v52 = vld [vmem:[#allocation2] sm:$0x1]  ;;  %v1065_v50 = vmul.f32 %v1051_v8, %v2583_v61 }
 0x182   : > { %v1100_v22 = vpack.c.bf16 %v2770_v49, %v2764_v54  ;;  %v1068_v12 = vmul.f32 %v1035_v63, %v2604_v11  ;;  %1707 = vperm.xlu2 %2009, %v1704_v52   ;;  %v1060_v63 = vmul.f32 %v1030_v10, %v2561_v46 }
 0x183   : > { %1150 = vmatpush.bf16.msrb.mxu0 %v1099_v59  ;;  %v1069_v26 = vmul.f32 %v1054_v40, %v2606_v24 }
 0x184   : > { %1169 = vmatpush.bf16.msrb.mxu1 %v1100_v22 }
 0x185   : > { %v2817_v40 = vadd.f32 %v1069_v26, %v2606_v24  ;;  %v1959_v26 = vld [vmem:[%s3101_s3 + $0x18] sm:$0xff] }
 0x187   : > { %v1036_v29 = vpop.f32.mrf.mxu2  ;;  %1151 = vmatpush.bf16.msrb.mxu0 %v1095_v2  ;;  %v2826_v2 = vadd.f32 %v1064_v16, %v2581_v60 }
 0x188   : > { %v1055_v15 = vpop.f32.mrf.mxu3  ;;  %v1037_v53 = vadd.f32 %v1036_v29, %v2694_v25  ;;  %1170 = vmatpush.bf16.msrb.mxu1 %v1096_v9  ;;  %v2829_v9 = vadd.f32 %v1065_v50, %v2583_v61  ;;  %v2839_v29 = vadd.f32 %v1061_v1, %v2563_v47 }
 0x189   : > { %v1056_v59 = vadd.f32 %v1055_v15, %v2694_v25  ;;  %v2814_v25 = vadd.f32 %v1068_v12, %v2604_v11  ;;  %v2836_v12 = vadd.f32 %v1060_v63, %v2561_v46 }
 0x18a   : > { %v1072_v32 = vmul.f32 %v1037_v53, %v2638_v39  ;;  %1896 = vmatmul.msk.bf16.vlgmr.msrb.gmra.mxu0 %vm975_vm5, %v1958_v48  ;;  %v1098_v52 = vpack.c.bf16 %v2829_v9, %v2839_v29 }
 0x18b   : > { %v1073_v22 = vmul.f32 %v1056_v59, %v2640_v42  ;;  %1898 = vmatmul.msk.bf16.vlgmr.msrb.gmra.mxu1 %vm975_vm5, %v1958_v48  ;;  %v1097_v15 = vpack.c.bf16 %v2826_v2, %v2836_v12 }
 0x18c   : > { %v2820_v44 = vadd.f32 %v1072_v32, %v2638_v39 }
 0x18d   : > { %v2823_v8 = vadd.f32 %v1073_v22, %v2640_v42 }
 0x18e   : > { %v1101_v10 = vpack.c.bf16 %v2820_v44, %v2814_v25 }
 0x18f   : > { %v1102_v3 = vpack.c.bf16 %v2823_v8, %v2817_v40 }
 0x190   : > { %1188 = vmatpush.bf16.msrb.mxu2 %v1101_v10 }
 0x191   : > { %1207 = vmatpush.bf16.msrb.mxu3 %v1102_v3 }
 0x194   : > { %1189 = vmatpush.bf16.msrb.mxu2 %v1097_v15 }
 0x195   : > { %1208 = vmatpush.bf16.msrb.mxu3 %v1098_v52 }
 0x197   : > { %1900 = vmatmul.msk.bf16.vlgmr.msrb.gmra.mxu2 %vm975_vm5, %v1958_v48 }
 0x198   : > { %1902 = vmatmul.msk.bf16.vlgmr.msrb.gmra.mxu3 %vm975_vm5, %v1958_v48 }
 0x19a   : > { %1897 = vmatmul.msk.bf16.gmra.mxu0 %vm975_vm5, %v1959_v26 }
 0x19b   : > { %1899 = vmatmul.msk.bf16.gmra.mxu1 %vm975_vm5, %v1959_v26 }
 0x1a7   : > { %1901 = vmatmul.msk.bf16.gmra.mxu2 %vm975_vm5, %v1959_v26 }
 0x1a8   : > { %1903 = vmatmul.msk.bf16.gmra.mxu3 %vm975_vm5, %v1959_v26 }
 0x207   : > { %v1153_v1 = vpop.f32.mrf.mxu0 }
 0x208   : > { %v1172_v53 = vpop.f32.mrf.mxu1  ;;  %v1154_v52 = vadd.f32 %v1153_v1, %v2700_v28 }
 0x209   : > { %v1173_v26 = vadd.f32 %v1172_v53, %v2700_v28 }
 0x20a   : > { %v1220_v31 = vmul.f32 %v1154_v52, %v2557_v23 }
 0x20f   : > { %v1155_v59 = vpop.f32.mrf.mxu0 }
 0x210   : > { %v1174_v16 = vpop.f32.mrf.mxu1  ;;  %v1156_v3 = vadd.f32 %v1155_v59, %v2702_v62 }
 0x211   : > { %v1175_v15 = vadd.f32 %v1174_v16, %v2702_v62 }
 0x212   : > { %v1224_v59 = vmul.f32 %v1156_v3, %v2571_v57 }
 0x213   : > { %v1225_v16 = vmul.f32 %v1175_v15, %v2573_v58 }
 0x215   : > { %v2886_v15 = vadd.f32 %v1225_v16, %v2776_v20  ;;  %v1960_v20 = vld [vmem:[%s3101_s3 + $0x20] sm:$0xff] }
 0x217   : > { %v1158_v50 = vpop.f32.mrf.mxu0 }
 0x218   : > { %v1177_v32 = vpop.f32.mrf.mxu1  ;;  %v1159_v63 = vadd.f32 %v1158_v50, %v2692_v17 }
 0x219   : > { %v1178_v10 = vadd.f32 %v1177_v32, %v2692_v17 }
 0x21a   : > { %v1191_v22 = vpop.f32.mrf.mxu2  ;;  %v1228_v43 = vmul.f32 %v1159_v63, %v2591_v13  ;;  %v1221_v63 = vmul.f32 %v1173_v26, %v2559_v51 }
 0x21b   : > { %v1210_v48 = vpop.f32.mrf.mxu3  ;;  %v1229_v41 = vmul.f32 %v1178_v10, %v2593_v14 }
 0x21c   : > { %v2871_v10 = vadd.f32 %v1228_v43, %v2761_v34  ;;  %v2896_v34 = vadd.f32 %v1221_v63, %v2787_v21 }
 0x21f   : > { %v1160_v6 = vpop.f32.mrf.mxu0 }
 0x220   : > { %v1179_v45 = vpop.f32.mrf.mxu1  ;;  %v1161_v36 = vadd.f32 %v1160_v6, %v2698_v5  ;;  %v2874_v6 = vadd.f32 %v1229_v41, %v2764_v54  ;;  %v2893_v41 = vadd.f32 %v1220_v31, %v2784_v0 }
 0x221   : > { %v1180_v50 = vadd.f32 %v1179_v45, %v2698_v5 }
 0x222   : > { %v1193_v38 = vpop.f32.mrf.mxu2  ;;  %v1232_v1 = vmul.f32 %v1161_v36, %v2617_v19  ;;  %v2883_v36 = vadd.f32 %v1224_v59, %v2773_v56  ;;  %v1258_v56 = vpack.c.bf16 %v2886_v15, %v2896_v34  ;;  %v1211_v59 = vadd.f32 %v1210_v48, %v2700_v28 }
 0x223   : > { %v1212_v32 = vpop.f32.mrf.mxu3  ;;  %v1233_v53 = vmul.f32 %v1180_v50, %v2619_v33  ;;  %v1194_v21 = vadd.f32 %v1193_v38, %v2702_v62  ;;  %v1192_v50 = vadd.f32 %v1191_v22, %v2700_v28 }
 0x224   : > { %v2877_v45 = vadd.f32 %v1232_v1, %v2767_v55  ;;  %v1213_v26 = vadd.f32 %v1212_v32, %v2702_v62  ;;  %v1223_v48 = vmul.f32 %v1211_v59, %v2563_v47 }
 0x225   : > { %v2880_v3 = vadd.f32 %v1233_v53, %v2770_v49  ;;  %v1257_v49 = vpack.c.bf16 %v2883_v36, %v2893_v41  ;;  %v1222_v28 = vmul.f32 %v1192_v50, %v2561_v46 }
 0x226   : > { %v1261_v52 = vpack.c.bf16 %v2877_v45, %v2871_v10  ;;  %v1227_v38 = vmul.f32 %v1213_v26, %v2583_v61 }
 0x227   : > { %v1262_v43 = vpack.c.bf16 %v2880_v3, %v2874_v6 }
 0x228   : > { %1312 = vmatpush.bf16.msra.mxu0 %v1261_v52 }
 0x229   : > { %1331 = vmatpush.bf16.msra.mxu1 %v1262_v43  ;;  %v1226_v43 = vmul.f32 %v1194_v21, %v2581_v60 }
 0x22a   : > { %v1196_v54 = vpop.f32.mrf.mxu2 }
 0x22b   : > { %v1215_v55 = vpop.f32.mrf.mxu3  ;;  %v1197_v31 = vadd.f32 %v1196_v54, %v2692_v17 }
 0x22c   : > { %1313 = vmatpush.bf16.msra.mxu0 %v1257_v49  ;;  %v1216_v0 = vadd.f32 %v1215_v55, %v2692_v17  ;;  %v2936_v49 = vadd.f32 %v1226_v43, %v2826_v2 }
 0x22d   : > { %1332 = vmatpush.bf16.msra.mxu1 %v1258_v56  ;;  %v1230_v53 = vmul.f32 %v1197_v31, %v2604_v11  ;;  %v2939_v56 = vadd.f32 %v1227_v38, %v2829_v9 }
 0x22e   : > { %v1231_v63 = vmul.f32 %v1216_v0, %v2606_v24 }
 0x22f   : > { %1920 = vmatmul.msk.bf16.vlgmr.msra.gmra.mxu0 %vm975_vm5, %v1960_v20  ;;  %v2924_v32 = vadd.f32 %v1230_v53, %v2814_v25 }
 0x230   : > { %1922 = vmatmul.msk.bf16.vlgmr.msra.gmra.mxu1 %vm975_vm5, %v1960_v20  ;;  %v2927_v54 = vadd.f32 %v1231_v63, %v2817_v40  ;;  %v2946_v40 = vadd.f32 %v1222_v28, %v2836_v12 }
 0x232   : > { %v1198_v16 = vpop.f32.mrf.mxu2  ;;  %v1259_v2 = vpack.c.bf16 %v2936_v49, %v2946_v40 }
 0x233   : > { %v1217_v1 = vpop.f32.mrf.mxu3  ;;  %v1199_v17 = vadd.f32 %v1198_v16, %v2698_v5 }
 0x234   : > { %v1218_v52 = vadd.f32 %v1217_v1, %v2698_v5 }
 0x235   : > { %v1234_v62 = vmul.f32 %v1199_v17, %v2638_v39 }
 0x236   : > { %v1235_v22 = vmul.f32 %v1218_v52, %v2640_v42 }
 0x237   : > { %v2930_v5 = vadd.f32 %v1234_v62, %v2820_v44  ;;  %v2949_v44 = vadd.f32 %v1223_v48, %v2839_v29 }
 0x238   : > { %v2933_v55 = vadd.f32 %v1235_v22, %v2823_v8  ;;  %v1961_v8 = vld [vmem:[%s3101_s3 + $0x28] sm:$0xff] }
 0x239   : > { %v1263_v31 = vpack.c.bf16 %v2930_v5, %v2924_v32  ;;  %v1260_v9 = vpack.c.bf16 %v2939_v56, %v2949_v44 }
 0x23a   : > { %v1264_v25 = vpack.c.bf16 %v2933_v55, %v2927_v54 }
 0x23b   : > { %1350 = vmatpush.bf16.msra.mxu2 %v1263_v31 }
 0x23c   : > { %1369 = vmatpush.bf16.msra.mxu3 %v1264_v25 }
 0x23f   : > { %1351 = vmatpush.bf16.msra.mxu2 %v1259_v2  ;;  %1921 = vmatmul.msk.bf16.gmra.mxu0 %vm975_vm5, %v1961_v8 }
 0x240   : > { %1370 = vmatpush.bf16.msra.mxu3 %v1260_v9  ;;  %1923 = vmatmul.msk.bf16.gmra.mxu1 %vm975_vm5, %v1961_v8 }
 0x242   : > { %1924 = vmatmul.msk.bf16.vlgmr.msra.gmra.mxu2 %vm975_vm5, %v1960_v20 }
 0x243   : > { %1926 = vmatmul.msk.bf16.vlgmr.msra.gmra.mxu3 %vm975_vm5, %v1960_v20 }
 0x252   : > { %1925 = vmatmul.msk.bf16.gmra.mxu2 %vm975_vm5, %v1961_v8 }
 0x253   : > { %1927 = vmatmul.msk.bf16.gmra.mxu3 %vm975_vm5, %v1961_v8 }
 0x2ac   : > { %v1315_v12 = vpop.f32.mrf.mxu0 }
 0x2ad   : > { %v1334_v29 = vpop.f32.mrf.mxu1  ;;  %v1316_v20 = vadd.f32 %v1315_v12, %v2708_v35 }
 0x2ae   : > { %v1335_v63 = vadd.f32 %v1334_v29, %v2708_v35 }
 0x2af   : > { %v1382_v9 = vmul.f32 %v1316_v20, %v2557_v23 }
 0x2b4   : > { %v1317_v0 = vpop.f32.mrf.mxu0 }
 0x2b5   : > { %v1336_v21 = vpop.f32.mrf.mxu1  ;;  %v1318_v1 = vadd.f32 %v1317_v0, %v2710_v4 }
 0x2b6   : > { %v1337_v53 = vadd.f32 %v1336_v21, %v2710_v4 }
 0x2b7   : > { %v1386_v31 = vmul.f32 %v1318_v1, %v2571_v57 }
 0x2b8   : > { %v1387_v25 = vmul.f32 %v1337_v53, %v2573_v58 }
 0x2b9   : > { %v1402_v57 = vadd.f32 %v1386_v31, %v2883_v36 }
 0x2ba   : > { %v1403_v58 = vadd.f32 %v1387_v25, %v2886_v15 }
 0x2bc   : > { %v1320_v26 = vpop.f32.mrf.mxu0 }
 0x2bd   : > { %v1339_v50 = vpop.f32.mrf.mxu1  ;;  %v1321_v59 = vadd.f32 %v1320_v26, %v2704_v30 }
 0x2be   : > { %v1340_v16 = vadd.f32 %v1339_v50, %v2704_v30 }
 0x2bf   : > { %v1390_v43 = vmul.f32 %v1321_v59, %v2591_v13  ;;  %v1383_v13 = vmul.f32 %v1335_v63, %v2559_v51 }
 0x2c0   : > { %v1391_v38 = vmul.f32 %v1340_v16, %v2593_v14 }
 0x2c1   : > { %v1406_v14 = vadd.f32 %v1390_v43, %v2871_v10  ;;  %v1399_v23 = vadd.f32 %v1383_v13, %v2896_v34 }
 0x2c2   : > { %v1407_v12 = vadd.f32 %v1391_v38, %v2874_v6 }
 0x2c3   : > { %v1419_v6 = vpack.c.bf16 %v1403_v58, %v1399_v23 }
 0x2c4   : > { %v1322_v17 = vpop.f32.mrf.mxu0 }
 0x2c5   : > { %v1341_v52 = vpop.f32.mrf.mxu1  ;;  %v1323_v62 = vadd.f32 %v1322_v17, %v2706_v27  ;;  %v1353_v28 = vpop.f32.mrf.mxu2 }
 0x2c6   : > { %v1342_v22 = vadd.f32 %v1341_v52, %v2706_v27  ;;  %v1372_v48 = vpop.f32.mrf.mxu3  ;;  %v1354_v59 = vadd.f32 %v1353_v28, %v2708_v35 }
 0x2c7   : > { %v1394_v8 = vmul.f32 %v1323_v62, %v2617_v19  ;;  %v1373_v16 = vadd.f32 %v1372_v48, %v2708_v35  ;;  %v1963_v35 = vld [vmem:[%s3103_s5 + $0x8] sm:$0xff] }
 0x2c8   : > { %v1395_v2 = vmul.f32 %v1342_v22, %v2619_v33  ;;  %v1398_v33 = vadd.f32 %v1382_v9, %v2893_v41 }
 0x2c9   : > { %v1410_v29 = vadd.f32 %v1394_v8, %v2877_v45  ;;  %v1962_v45 = vld [vmem:[%s3103_s5] sm:$0xff] }
 0x2ca   : > { %v1411_v0 = vadd.f32 %v1395_v2, %v2880_v3  ;;  %v1418_v10 = vpack.c.bf16 %v1402_v57, %v1398_v33 }
 0x2cb   : > { %v1422_v21 = vpack.c.bf16 %v1410_v29, %v1406_v14 }
 0x2cc   : > { %v1423_v19 = vpack.c.bf16 %v1411_v0, %v1407_v12  ;;  %v3137_v12 = vld [vmem:[#allocation6_spill] sm:$0xff] }
 0x2cd   : > { %v1355_v26 = vpop.f32.mrf.mxu2  ;;  %1472 = vmatpush.bf16.msrb.mxu0 %v1422_v21 }
 0x2ce   : > { %v1374_v51 = vpop.f32.mrf.mxu3  ;;  %1491 = vmatpush.bf16.msrb.mxu1 %v1423_v19  ;;  %v1356_v34 = vadd.f32 %v1355_v26, %v2710_v4 }
 0x2cf   : > { %v1375_v50 = vadd.f32 %v1374_v51, %v2710_v4 }
 0x2d1   : > { %1473 = vmatpush.bf16.msrb.mxu0 %v1418_v10  ;;  %v1389_v43 = vmul.f32 %v1375_v50, %v2583_v61 }
 0x2d2   : > { %1492 = vmatpush.bf16.msrb.mxu1 %v1419_v6 }
 0x2d4   : > { %1936 = vmatmul.msk.bf16.vlgmr.msrb.gmra.mxu0 %vm975_vm5, %v1962_v45 }
 0x2d5   : > { %1938 = vmatmul.msk.bf16.vlgmr.msrb.gmra.mxu1 %vm975_vm5, %v1962_v45  ;;  %v1358_v3 = vpop.f32.mrf.mxu2 }
 0x2d6   : > { %v1377_v36 = vpop.f32.mrf.mxu3  ;;  %v1359_v15 = vadd.f32 %v1358_v3, %v2704_v30 }
 0x2d7   : > { %v1378_v41 = vadd.f32 %v1377_v36, %v2704_v30  ;;  %v1388_v30 = vmul.f32 %v1356_v34, %v2581_v60 }
 0x2d8   : > { %v1392_v20 = vmul.f32 %v1359_v15, %v2604_v11  ;;  %v1384_v11 = vmul.f32 %v1354_v59, %v2561_v46 }
 0x2d9   : > { %v1393_v63 = vmul.f32 %v1378_v41, %v2606_v24  ;;  %v1385_v24 = vmul.f32 %v1373_v16, %v2563_v47  ;;  %v1964_v41 = vld [vmem:[%s3105_s7] sm:$0xff] }
 0x2da   : > { %v1408_v62 = vadd.f32 %v1392_v20, %v2924_v32  ;;  %v1400_v46 = vadd.f32 %v1384_v11, %v2946_v40 }
 0x2db   : > { %v1401_v47 = vadd.f32 %v1385_v24, %v2949_v44 }
 0x2dd   : > { %v1360_v1 = vpop.f32.mrf.mxu2 }
 0x2de   : > { %v1379_v53 = vpop.f32.mrf.mxu3  ;;  %v1361_v17 = vadd.f32 %v1360_v1, %v2706_v27 }
 0x2df   : > { %v1380_v52 = vadd.f32 %v1379_v53, %v2706_v27  ;;  %v1409_v27 = vadd.f32 %v1393_v63, %v2927_v54 }
 0x2e0   : > { %v1396_v4 = vmul.f32 %v1361_v17, %v2638_v39  ;;  %v1404_v39 = vadd.f32 %v1388_v30, %v2936_v49 }
 0x2e1   : > { %v1397_v38 = vmul.f32 %v1380_v52, %v2640_v42  ;;  %v1405_v42 = vadd.f32 %v1389_v43, %v2939_v56 }
 0x2e2   : > { %v1412_v60 = vadd.f32 %v1396_v4, %v2930_v5  ;;  %v1420_v32 = vpack.c.bf16 %v1404_v39, %v1400_v46  ;;  %v3138_v46 = vld [vmem:[#allocation7_spill] sm:$0xff] }
 0x2e3   : > { %v1413_v61 = vadd.f32 %v1397_v38, %v2933_v55  ;;  %v1421_v54 = vpack.c.bf16 %v1405_v42, %v1401_v47 }
 0x2e4   : > { %v1424_v22 = vpack.c.bf16 %v1412_v60, %v1408_v62  ;;  %1937 = vmatmul.msk.bf16.gmra.mxu0 %vm975_vm5, %v1963_v35 }
 0x2e5   : > { %v1425_v28 = vpack.c.bf16 %v1413_v61, %v1409_v27  ;;  %1939 = vmatmul.msk.bf16.gmra.mxu1 %vm975_vm5, %v1963_v35 }
 0x2e6   : > { %1510 = vmatpush.bf16.msrb.mxu2 %v1424_v22 }
 0x2e7   : > { %1529 = vmatpush.bf16.msrb.mxu3 %v1425_v28 }
 0x2ea   : > { %1511 = vmatpush.bf16.msrb.mxu2 %v1420_v32 }
 0x2eb   : > { %1530 = vmatpush.bf16.msrb.mxu3 %v1421_v54  ;;  %v3139_v54 = vld [vmem:[#allocation9_spill] sm:$0xff] }
 0x2ed   : > { %1940 = vmatmul.msk.bf16.vlgmr.msrb.gmra.mxu2 %vm975_vm5, %v1962_v45 }
 0x2ee   : > { %1942 = vmatmul.msk.bf16.vlgmr.msrb.gmra.mxu3 %vm975_vm5, %v1962_v45 }
 0x2fd   : > { %1941 = vmatmul.msk.bf16.gmra.mxu2 %vm975_vm5, %v1963_v35 }
 0x2fe   : > { %1943 = vmatmul.msk.bf16.gmra.mxu3 %vm975_vm5, %v1963_v35 }
 0x351   : > { %v1475_v5 = vpop.f32.mrf.mxu0 }
 0x352   : > { %v1494_v55 = vpop.f32.mrf.mxu1  ;;  %v1476_v29 = vadd.f32 %v1475_v5, %v3137_v12  ;;  %v899_v5 = vrot.slane %v3139_v54, 4 }
 0x353   : > { %v1495_v0 = vadd.f32 %v1494_v55, %v3137_v12  ;;  %v3140_v55 = vld [vmem:[#allocation10_spill] sm:$0xff] }
 0x354   : > { %v1542_v10 = vmax.f32 %v1476_v29, 0.0  ;;  %v1662_v29 = vpop.permute.xlu1 %1661 }
 0x355   : > { %v1543_v6 = vmax.f32 %v1495_v0, 0.0 }
 0x359   : > { %v1477_v49 = vpop.f32.mrf.mxu0 }
 0x35a   : > { %v1496_v56 = vpop.f32.mrf.mxu1  ;;  %v1478_v2 = vadd.f32 %v1477_v49, %v2718_v37  ;;  %v907_v49 = vrot.slane %v3140_v55, 4 }
 0x35b   : > { %v1497_v9 = vadd.f32 %v1496_v56, %v2718_v37 }
 0x35c   : > { %v1546_v33 = vmax.f32 %v1478_v2, 0.0  ;;  %v900_v2 = vadd.f32 %v899_v5, %v3139_v54 }
 0x35d   : > { %v1547_v23 = vmax.f32 %v1497_v9, 0.0  ;;  %v908_v9 = vadd.f32 %v907_v49, %v3140_v55 }
 0x35e   : > { %v1560_v36 = vpack.c.bf16 %v1546_v33, %v1542_v10 }
 0x35f   : > { %v1561_v15 = vpack.c.bf16 %v1547_v23, %v1543_v6  ;;  %v909_v33 = vrot.slane %v908_v9, 2 }
 0x361   : > { %v1480_v40 = vpop.f32.mrf.mxu0 }
 0x362   : > { %v1499_v44 = vpop.f32.mrf.mxu1  ;;  %v1481_v48 = vadd.f32 %v1480_v40, %v2712_v7 }
 0x363   : > { %v1500_v31 = vadd.f32 %v1499_v44, %v2712_v7 }
 0x364   : > { %v1550_v57 = vmax.f32 %v1481_v48, 0.0 }
 0x365   : > { %v1551_v58 = vmax.f32 %v1500_v31, 0.0  ;;  %v3141_v31 = vld [vmem:[#allocation8_spill] sm:$0xff] }
 0x369   : > { %v1482_v25 = vpop.f32.mrf.mxu0 }
 0x36a   : > { %v1501_v8 = vpop.f32.mrf.mxu1  ;;  %v1483_v13 = vadd.f32 %v1482_v25, %v2714_v18 }
 0x36b   : > { %v1502_v14 = vadd.f32 %v1501_v8, %v2714_v18 }
 0x36c   : > { %v1554_v21 = vmax.f32 %v1483_v13, 0.0 }
 0x36d   : > { %v1555_v19 = vmax.f32 %v1502_v14, 0.0 }
 0x36e   : > { %v1564_v26 = vpack.c.bf16 %v1554_v21, %v1550_v57 }
 0x36f   : > { %v1565_v51 = vpack.c.bf16 %v1555_v19, %v1551_v58  ;;  %v901_v19 = vrot.slane %v900_v2, 2 }
 0x370   : > { %v1513_v45 = vpop.f32.mrf.mxu2  ;;  %1594 = vmatpush.bf16.msra.mxu0 %v1564_v26 }
 0x371   : > { %v1532_v3 = vpop.f32.mrf.mxu3  ;;  %1608 = vmatpush.bf16.msra.mxu1 %v1565_v51  ;;  %v1514_v4 = vadd.f32 %v1513_v45, %v3137_v12  ;;  %v902_v6 = vadd.f32 %v901_v19, %v900_v2  ;;  %v910_v45 = vadd.f32 %v909_v33, %v908_v9 }
 0x372   : > { %v1533_v38 = vadd.f32 %v1532_v3, %v3137_v12  ;;  %v1657_v12 = vpop.permute.xlu0 %1656 }
 0x373   : > { %v1544_v39 = vmax.f32 %v1514_v4, 0.0 }
 0x374   : > { %1595 = vmatpush.bf16.msra.mxu0 %v1560_v36  ;;  %v1545_v42 = vmax.f32 %v1533_v38, 0.0 }
 0x375   : > { %1609 = vmatpush.bf16.msra.mxu1 %v1561_v15 }
 0x377   : > { %1948 = vmatmul.msk.bf16.vlgmr.msra.gmra.mxu0 %vm975_vm5, %v1964_v41 }
 0x378   : > { %1949 = vmatmul.msk.bf16.vlgmr.msra.gmra.mxu1 %vm975_vm5, %v1964_v41  ;;  %v1515_v34 = vpop.f32.mrf.mxu2 }
 0x379   : > { %v1534_v50 = vpop.f32.mrf.mxu3  ;;  %v1516_v17 = vadd.f32 %v1515_v34, %v2718_v37  ;;  %v903_v34 = vrot.slane %v902_v6, 1 }
 0x37a   : > { %v1535_v52 = vadd.f32 %v1534_v50, %v2718_v37  ;;  %v911_v50 = vrot.slane %v910_v45, 1 }
 0x37b   : > { %v1548_v27 = vmax.f32 %v1516_v17, 0.0 }
 0x37c   : > { %v912_v17 = vadd.f32 %v911_v50, %v910_v45 }
 0x37d   : > { %v1562_v37 = vpack.c.bf16 %v1548_v27, %v1544_v39  ;;  %v3142_v39 = vld [vmem:[#allocation11_spill] sm:$0xff] }
 0x380   : > { %v1518_v59 = vpop.f32.mrf.mxu2 }
 0x381   : > { %v1537_v16 = vpop.f32.mrf.mxu3  ;;  %v1519_v1 = vadd.f32 %v1518_v59, %v2712_v7 }
 0x382   : > { %v1538_v53 = vadd.f32 %v1537_v16, %v2712_v7  ;;  %v1549_v7 = vmax.f32 %v1535_v52, 0.0 }
 0x383   : > { %v1552_v35 = vmax.f32 %v1519_v1, 0.0 }
 0x384   : > { %v1553_v11 = vmax.f32 %v1538_v53, 0.0  ;;  %v1563_v22 = vpack.c.bf16 %v1549_v7, %v1545_v42  ;;  %v915_v42 = vrot.slane %v3142_v39, 4 }
 0x386   : > { %v916_v55 = vadd.f32 %v915_v42, %v3142_v39 }
 0x388   : > { %v1520_v20 = vpop.f32.mrf.mxu2 }
 0x389   : > { %v1539_v63 = vpop.f32.mrf.mxu3  ;;  %v1521_v30 = vadd.f32 %v1520_v20, %v2714_v18  ;;  %v1708_v20 = vpop.permute.xlu2 %1707 }
 0x38a   : > { %v1540_v43 = vadd.f32 %v1539_v63, %v2714_v18  ;;  %v904_v63 = vadd.f32 %v903_v34, %v902_v6 }
 0x38b   : > { %v1556_v24 = vmax.f32 %v1521_v30, 0.0 }
 0x38c   : > { %v1557_v62 = vmax.f32 %v1540_v43, 0.0  ;;  %v1710_v43 = vperm.slane %v1708_v20, 0 }
 0x38d   : > { %v1566_v60 = vpack.c.bf16 %v1556_v24, %v1552_v35 }
 0x38e   : > { %v1567_v61 = vpack.c.bf16 %v1557_v62, %v1553_v11 }
 0x38f   : > { %1622 = vmatpush.bf16.msra.mxu2 %v1566_v60 }
 0x390   : > { %1636 = vmatpush.bf16.msra.mxu3 %v1567_v61 }
 0x393   : > { %1623 = vmatpush.bf16.msra.mxu2 %v1562_v37  ;;  %v3143_v37 = vld [vmem:[#allocation12_spill] sm:$0xff] }
 0x394   : > { %1637 = vmatpush.bf16.msra.mxu3 %v1563_v22  ;;  %v923_v22 = vrot.slane %v3143_v37, 4 }
 0x396   : > { %1950 = vmatmul.msk.bf16.vlgmr.msra.gmra.mxu2 %vm975_vm5, %v1964_v41  ;;  %v924_v49 = vadd.f32 %v923_v22, %v3143_v37 }
 0x397   : > { %1951 = vmatmul.msk.bf16.vlgmr.msra.gmra.mxu3 %vm975_vm5, %v1964_v41 }
 0x398   : > { %v925_v2 = vrot.slane %v924_v49, 2 }
 0x3f4   : > { %v1597_v18 = vpop.f32.mrf.mxu0 }
 0x3f5   : > { %v1611_v28 = vpop.f32.mrf.mxu1  ;;  %v1598_v47 = vadd.f32 %v1597_v18, %v3138_v46 }
 0x3f6   : > { %v1612_v32 = vadd.f32 %v1611_v28, %v3138_v46 }
 0x3f7   : > { %v1644_v44 = vmax.f32 %v1598_v47, 0.0 }
 0x3f8   : > { %v1645_v48 = vmax.f32 %v1612_v32, 0.0 }
 0x3f9   : > { %v1664_v0 = vmul.f32 %v1657_v12, %v1644_v44 }
 0x3fa   : > { %v1665_v57 = vmul.f32 %v1657_v12, %v1645_v48 }
 0x3fc   : > { %v1599_v56 = vpop.f32.mrf.mxu0 }
 0x3fd   : > { %v1613_v40 = vpop.f32.mrf.mxu1  ;;  %v1600_v25 = vadd.f32 %v1599_v56, %v3141_v31 }
 0x3fe   : > { %v1614_v8 = vadd.f32 %v1613_v40, %v3141_v31 }
 0x3ff   : > { %v1648_v13 = vmax.f32 %v1600_v25, 0.0 }
 0x400   : > { %v1649_v14 = vmax.f32 %v1614_v8, 0.0  ;;  %v917_v8 = vrot.slane %v916_v55, 2 }
 0x401   : > { %v1668_v58 = vmul.f32 %v1662_v29, %v1648_v13 }
 0x402   : > { %v1669_v21 = vmul.f32 %v1662_v29, %v1649_v14 }
 0x403   : > { %v1672_v23 = vadd.f32 %v1668_v58, %v1664_v0  ;;  %v926_v58 = vadd.f32 %v925_v2, %v924_v49 }
 0x404   : > { %v1679_v26 = vadd.f32 %v1669_v21, %v1665_v57  ;;  %v918_v57 = vadd.f32 %v917_v8, %v916_v55 }
 0x405   : > { %v1673_v51 = vrot.slane %v1672_v23, 4 }
 0x406   : > { %v1680_v10 = vrot.slane %v1679_v26, 4 }
 0x407   : > { %v1674_v3 = vadd.f32 %v1673_v51, %v1672_v23  ;;  %v919_v23 = vrot.slane %v918_v57, 1 }
 0x408   : > { %v1681_v36 = vadd.f32 %v1680_v10, %v1679_v26  ;;  %v927_v26 = vrot.slane %v926_v58, 1 }
 0x409   : > { %v1675_v15 = vrot.slane %v1674_v3, 2  ;;  %v920_v6 = vadd.f32 %v919_v23, %v918_v57 }
 0x40a   : > { %v1682_v41 = vrot.slane %v1681_v36, 2  ;;  %v928_v45 = vadd.f32 %v927_v26, %v926_v58 }
 0x40b   : > { %v1676_v59 = vadd.f32 %v1675_v15, %v1674_v3 }
 0x40c   : > { %v1683_v16 = vadd.f32 %v1682_v41, %v1681_v36 }
 0x40d   : > { %v1677_v1 = vrot.slane %v1676_v59, 1 }
 0x40e   : > { %v1684_v53 = vrot.slane %v1683_v16, 1 }
 0x40f   : > { %v1678_v52 = vadd.f32 %v1677_v1, %v1676_v59  ;;  %v3144_v1 = vlaneseq }
 0x410   : > { %v1685_v30 = vadd.f32 %v1684_v53, %v1683_v16 }
 0x411   : > { %v1700_v4 = vadd.f32 %v1678_v52, %v904_v63  ;;  %vm1731_vm12 = vcmp.lt.s32.totalorder %v3144_v1, 512 }
 0x412   : > { %v1701_v38 = vadd.f32 %v1685_v30, %v912_v17 }
 0x413   : > { %v1711_v11 = vadd.f32 %v1710_v43, %v1700_v4 }
 0x414   : > { %v1712_v35 = vadd.f32 %v1710_v43, %v1701_v38 }
 0x416   : > { %v1719_v24 = vrot.slane %v1712_v35, 7 }
 0x418   : > { %v1723_v62 = vsel %vm1722_vm9, %v1711_v11, %v1719_v24 }
 0x419   : > { %v1625_v27 = vpop.f32.mrf.mxu2 }
 0x41a   : > { %v1639_v7 = vpop.f32.mrf.mxu3  ;;  %v1626_v60 = vadd.f32 %v1625_v27, %v3138_v46 }
 0x41b   : > { %v1640_v61 = vadd.f32 %v1639_v7, %v3138_v46 }
 0x41c   : > { %v1646_v47 = vmax.f32 %v1626_v60, 0.0 }
 0x41d   : > { %v1647_v32 = vmax.f32 %v1640_v61, 0.0 }
 0x41e   : > { %v1666_v44 = vmul.f32 %v1657_v12, %v1646_v47 }
 0x41f   : > { %v1667_v46 = vmul.f32 %v1657_v12, %v1647_v32 }
 0x421   : > { %v1627_v18 = vpop.f32.mrf.mxu2 }
 0x422   : > { %v1641_v28 = vpop.f32.mrf.mxu3  ;;  %v1628_v54 = vadd.f32 %v1627_v18, %v3141_v31 }
 0x423   : > { %v1642_v5 = vadd.f32 %v1641_v28, %v3141_v31 }
 0x424   : > { %v1650_v56 = vmax.f32 %v1628_v54, 0.0 }
 0x425   : > { %v1651_v40 = vmax.f32 %v1642_v5, 0.0 }
 0x426   : > { %v1670_v48 = vmul.f32 %v1662_v29, %v1650_v56 }
 0x427   : > { %v1671_v25 = vmul.f32 %v1662_v29, %v1651_v40 }
 0x428   : > { %v1686_v9 = vadd.f32 %v1670_v48, %v1666_v44 }
 0x429   : > { %v1693_v13 = vadd.f32 %v1671_v25, %v1667_v46 }
 0x42a   : > { %v1687_v14 = vrot.slane %v1686_v9, 4 }
 0x42b   : > { %v1694_v0 = vrot.slane %v1693_v13, 4 }
 0x42c   : > { %v1688_v31 = vadd.f32 %v1687_v14, %v1686_v9 }
 0x42d   : > { %v1695_v21 = vadd.f32 %v1694_v0, %v1693_v13 }
 0x42e   : > { %v1689_v19 = vrot.slane %v1688_v31, 2 }
 0x42f   : > { %v1696_v33 = vrot.slane %v1695_v21, 2 }
 0x430   : > { %v1690_v51 = vadd.f32 %v1689_v19, %v1688_v31 }
 0x431   : > { %v1697_v12 = vadd.f32 %v1696_v33, %v1695_v21 }
 0x432   : > { %v1691_v29 = vrot.slane %v1690_v51, 1 }
 0x433   : > { %v1698_v10 = vrot.slane %v1697_v12, 1 }
 0x434   : > { %v1692_v3 = vadd.f32 %v1691_v29, %v1690_v51 }
 0x435   : > { %v1699_v36 = vadd.f32 %v1698_v10, %v1697_v12 }
 0x436   : > { %v1702_v15 = vadd.f32 %v1692_v3, %v920_v6 }
 0x437   : > { %v1703_v41 = vadd.f32 %v1699_v36, %v928_v45 }
 0x438   : > { %v1713_v34 = vadd.f32 %v1710_v43, %v1702_v15 }
 0x439   : > { %v1714_v50 = vadd.f32 %v1710_v43, %v1703_v41 }
 0x43a   : > { %v1720_v59 = vrot.slane %v1713_v34, 6 }
 0x43b   : > { %v1721_v16 = vrot.slane %v1714_v50, 5 }
 0x43d   : > { %v1725_v53 = vsel %vm1724_vm10, %v1720_v59, %v1721_v16 }
 0x43e   : > { %v1727_v20 = vsel %vm1726_vm11, %v1723_v62, %v1725_v53 }
 0x43f   : > { %1733 = vst.msk [vmem:[%s382_s26] sm:$0xf] %vm1731_vm12, %v1727_v20 }
 0x440   : > { %2037 = shalt.err (!%p2034_p3)
}
 0x441   : > { %1965 = dma.vmem_to_hbm [thread:$0]  (%p2175_p5), %s1748_s12, 64, %s1750_s13, %s1735_s14  }
 0x442 PF: > { %p1971_p4 = scmp.ge.s32.totalorder %s2072_s22, 2  ;;  %s1761_s17 = sand.u32 1, %s2060_s19  }
 0x443   : > { %s1762_s26 = scalar_lea.sflag [#allocation4], %s1761_s17 }
 0x444   : > { %p1968_p7 = pnand %p1971_p4, %p2179_p6 }
 0x446   : > { %p1969_p8 = pneg %p1968_p7 }
 0x448   : > { %2055 = dma.done.wait (%p1969_p8), %s1762_s26, 64  }
 0x449   : > { %2057 = vsyncadd (%p1969_p8), %s1762_s26, 4294967232  ;;  %p23_p9 = scmp.ge.s32.totalorder %s2163_s24, 4   ;;  %s3145_s19 = smov %s2064_s20 }
 0x44a   : > { %s3146_s20 = smov %s2068_s21  ;;  %s3147_s21 = smov %s2173_s27 }
 0x44b   : > { %s3148_s22 = smov %s2163_s24  ;;  %25 = sbr.rel (!%p23_p9) target bundleno = 6 (0x6), region = 103 }
 0x450   :  { %1768 = vsyncpa [#allocation4], 1 }
 0x451   :  { %1770 = vsyncpa [#allocation4 + $0x1], 1 }

</bundles_post_ra>
